<compile_context>
chip_gen: v7x
topology: tpu7x:2x2x1
jax: 0.10.0
libtpu: 0.0.40
codegen_flags: <defaults>
</compile_context>

<pallas_src>
import functools
import math

import jax
import jax.numpy as jnp
import numpy as np
from jax.experimental import pallas as pl
from jax.experimental.pallas import tpu as pltpu

LN_EPS = 1e-5      # torch.nn.LayerNorm default
NEG_BIG = 1e9      # finite stand-in for -inf in the attention mask


def _layer_norm(v, g, b):
    mu = jnp.mean(v, axis=-1, keepdims=True)
    var = jnp.mean((v - mu) ** 2, axis=-1, keepdims=True)
    return (v - mu) * jax.lax.rsqrt(var + LN_EPS) * g + b


def encoder_layer_kernel(mask_ref, x_ref,
                         ln0_g_ref, ln0_b_ref,
                         wqkv_ref, bqkv_ref, wo_ref, bo_ref,
                         ln1_g_ref, ln1_b_ref,
                         w1_ref, b1_ref, w2_ref, b2_ref,
                         out_ref, *, H):
    B, S, D = x_ref.shape
    Dh = wo_ref.shape[0]                 # d_hidden = H * d_k
    d_k = Dh // H
    scale = 1.0 / math.sqrt(d_k)

    x = x_ref[...].reshape(B * S, D)     # flatten batch into the row axis (free reshape)
    # additive key-mask bias: 0 where kept, -1e9 where masked  -> (B, 1, S), computed once
    mask_bias = (mask_ref[...] - 1.0) * NEG_BIG

    # ---- residual block 0: x1 = x + MHA(LayerNorm(x)) ----
    y = _layer_norm(x, ln0_g_ref[...], ln0_b_ref[...])

    # single fused QKV projection, biases added once
    qkv = jnp.dot(y, wqkv_ref[...], preferred_element_type=jnp.float32) + bqkv_ref[...]
    q = qkv[:, 0:Dh] * scale             # fold 1/sqrt(d_k) into Q once
    k = qkv[:, Dh:2 * Dh]
    v = qkv[:, 2 * Dh:3 * Dh]

    heads = []
    for h in range(H):                   # short unrolled loop; core is batched over B
        lo, hi = h * d_k, (h + 1) * d_k
        qh = q[:, lo:hi].reshape(B, S, d_k)
        kh = k[:, lo:hi].reshape(B, S, d_k)
        vh = v[:, lo:hi].reshape(B, S, d_k)

        s = jnp.einsum('bqd,bkd->bqk', qh, kh,
                       preferred_element_type=jnp.float32) + mask_bias    # (B, S, S)
        m = jnp.max(s, axis=-1, keepdims=True)
        e = jnp.exp(s - m)
        p = e * pl.reciprocal(jnp.sum(e, axis=-1, keepdims=True), approx=True)
        oh = jnp.einsum('bqk,bkd->bqd', p, vh,
                        preferred_element_type=jnp.float32)               # (B, S, d_k)
        heads.append(oh.reshape(B * S, d_k))

    att = jnp.concatenate(heads, axis=-1)                                 # (B*S, Dh)
    att = jnp.dot(att, wo_ref[...], preferred_element_type=jnp.float32) + bo_ref[...]
    x1 = x + att

    # ---- residual block 1: out = x1 + FFN(LayerNorm(x1)) ----
    y2 = _layer_norm(x1, ln1_g_ref[...], ln1_b_ref[...])
    hdn = jnp.maximum(
        jnp.dot(y2, w1_ref[...], preferred_element_type=jnp.float32) + b1_ref[...], 0.0)
    ff = jnp.dot(hdn, w2_ref[...], preferred_element_type=jnp.float32) + b2_ref[...]

    out_ref[...] = (x1 + ff).reshape(B, S, D)


def encoder_layer(x, src_mask, params, H):
    B, S, D = x.shape
    vmem = pl.BlockSpec(memory_space=pltpu.MemorySpace.VMEM)  # full array, resident in VMEM
    n_in = 2 + len(params)
    return pl.pallas_call(
        functools.partial(encoder_layer_kernel, H=H),
        out_shape=jax.ShapeDtypeStruct((B, S, D), jnp.float32),
        in_specs=[vmem] * n_in,
        out_specs=vmem,
    )(src_mask, x, *params)


def reference(x, mask, params, H):
    """Plain-JAX reference (mirrors the PyTorch forward, exact softmax / -inf mask)."""
    (ln0_g, ln0_b, wqkv, bqkv, wo, bo, ln1_g, ln1_b, w1, b1, w2, b2) = params
    B, S, D = x.shape
    Dh = wo.shape[0]
    d_k = Dh // H

    def ln(v, g, b):
        mu = v.mean(-1, keepdims=True)
        var = ((v - mu) ** 2).mean(-1, keepdims=True)
        return (v - mu) / jnp.sqrt(var + LN_EPS) * g[0] + b[0]

    y = ln(x, ln0_g, ln0_b)
    qkv = y @ wqkv + bqkv[0]
    q, k, v = jnp.split(qkv, 3, axis=-1)

    def split_heads(t):  # (B,S,Dh) -> (B,H,S,d_k)
        return t.reshape(B, S, H, d_k).transpose(0, 2, 1, 3)

    q, k, v = split_heads(q), split_heads(k), split_heads(v)
    s = jnp.einsum('bhqd,bhkd->bhqk', q, k) / math.sqrt(d_k)
    s = jnp.where(mask[:, None, :, :] == 0.0, -jnp.inf, s)
    p = jax.nn.softmax(s, axis=-1)
    att = jnp.einsum('bhqk,bhkd->bhqd', p, v)
    att = att.transpose(0, 2, 1, 3).reshape(B, S, Dh)
    att = att @ wo + bo[0]
    x1 = x + att
    y2 = ln(x1, ln1_g, ln1_b)
    ff = jax.nn.relu(y2 @ w1 + b1[0]) @ w2 + b2[0]
    return x1 + ff


if __name__ == "__main__":
    B, S, D, H = 2, 8, 32, 8
    d_hidden = D                 # d_hidden defaults to d_model
    d_k = d_hidden // H
    d_ff = 4 * D                 # d_ff defaults to 4 * d_model

    key = jax.random.PRNGKey(0)
    ks = jax.random.split(key, 16)

    def xavier(k, fan_in, fan_out):
        bound = math.sqrt(6.0 / (fan_in + fan_out))
        return jax.random.uniform(k, (fan_in, fan_out), jnp.float32, -bound, bound)

    def lin_bias(k, fan_in, n):
        bound = 1.0 / math.sqrt(fan_in)
        return jax.random.uniform(k, (1, n), jnp.float32, -bound, bound)

    # attention projections, stored fused: wqkv (D, 3*Dh), bqkv (1, 3*Dh)
    wq = xavier(ks[0], D, d_hidden)
    bq = lin_bias(ks[1], D, d_hidden)
    wk = xavier(ks[2], D, d_hidden)
    bk = lin_bias(ks[3], D, d_hidden)
    wv = xavier(ks[4], D, d_hidden)
    bv = lin_bias(ks[5], D, d_hidden)
    wqkv = jnp.concatenate([wq, wk, wv], axis=1)
    bqkv = jnp.concatenate([bq, bk, bv], axis=1)

    wo = xavier(ks[6], d_hidden, D)      # (Dh, D) output projection on concatenated heads
    bo = lin_bias(ks[7], d_hidden, D)    # (1, D)

    # LayerNorm params
    ln0_g = jnp.ones((1, D), jnp.float32)
    ln0_b = jnp.zeros((1, D), jnp.float32)
    ln1_g = jnp.ones((1, D), jnp.float32)
    ln1_b = jnp.zeros((1, D), jnp.float32)

    # feed-forward
    w1 = xavier(ks[8], D, d_ff)
    b1 = lin_bias(ks[9], D, d_ff)
    w2 = xavier(ks[10], d_ff, D)
    b2 = lin_bias(ks[11], d_ff, D)

    params = (ln0_g, ln0_b, wqkv, bqkv, wo, bo, ln1_g, ln1_b, w1, b1, w2, b2)

    x = jax.random.normal(ks[12], (B, S, D), jnp.float32)
    src_mask = jnp.ones((B, 1, S), jnp.float32).at[1, 0, S - 1].set(0.0)

    out = jax.jit(lambda xx, mm: encoder_layer(xx, mm, params, H))(x, src_mask)
    out = jax.block_until_ready(out)

    ref = reference(x, src_mask, params, H)
    # tolerance covers the (deliberate) approx reciprocal in the softmax normalization
    np.testing.assert_allclose(np.asarray(out), np.asarray(ref), rtol=5e-3, atol=5e-3)
    print("KERNEL_OK")
</pallas_src>

<mosaic_0001>
module attributes {stable_mosaic.version = 11 : i64} {
  func.func @encoder_layer_kernel(%arg0: memref<2x1x8xf32, #tpu.memory_space<vmem>>, %arg1: memref<2x8x32xf32, #tpu.memory_space<vmem>>, %arg2: memref<1x32xf32, #tpu.memory_space<vmem>>, %arg3: memref<1x32xf32, #tpu.memory_space<vmem>>, %arg4: memref<32x96xf32, #tpu.memory_space<vmem>>, %arg5: memref<1x96xf32, #tpu.memory_space<vmem>>, %arg6: memref<32x32xf32, #tpu.memory_space<vmem>>, %arg7: memref<1x32xf32, #tpu.memory_space<vmem>>, %arg8: memref<1x32xf32, #tpu.memory_space<vmem>>, %arg9: memref<1x32xf32, #tpu.memory_space<vmem>>, %arg10: memref<32x128xf32, #tpu.memory_space<vmem>>, %arg11: memref<1x128xf32, #tpu.memory_space<vmem>>, %arg12: memref<128x32xf32, #tpu.memory_space<vmem>>, %arg13: memref<1x32xf32, #tpu.memory_space<vmem>>, %arg14: memref<2x8x32xf32, #tpu.memory_space<vmem>>) attributes {dimension_semantics = [], scalar_prefetch = 0 : i64, scratch_operands = 0 : i64, tpu.core_type = #tpu.core_type<tc>} {
    %c0 = arith.constant 0 : index
    %c0_0 = arith.constant 0 : index
    %c0_1 = arith.constant 0 : index
    %0 = vector.load %arg1[%c0, %c0_0, %c0_1] : memref<2x8x32xf32, #tpu.memory_space<vmem>>, vector<2x8x32xf32>
    %1 = vector.shape_cast %0 : vector<2x8x32xf32> to vector<16x32xf32>
    %c0_2 = arith.constant 0 : index
    %c0_3 = arith.constant 0 : index
    %c0_4 = arith.constant 0 : index
    %2 = vector.load %arg0[%c0_2, %c0_3, %c0_4] : memref<2x1x8xf32, #tpu.memory_space<vmem>>, vector<2x1x8xf32>
    %cst = arith.constant 1.000000e+00 : f32
    %3 = vector.broadcast %cst : f32 to vector<2x1x8xf32>
    %4 = arith.subf %2, %3 : vector<2x1x8xf32>
    %cst_5 = arith.constant 1.000000e+09 : f32
    %5 = vector.broadcast %cst_5 : f32 to vector<2x1x8xf32>
    %6 = arith.mulf %4, %5 : vector<2x1x8xf32>
    %c0_6 = arith.constant 0 : index
    %c0_7 = arith.constant 0 : index
    %7 = vector.load %arg2[%c0_6, %c0_7] : memref<1x32xf32, #tpu.memory_space<vmem>>, vector<1x32xf32>
    %c0_8 = arith.constant 0 : index
    %c0_9 = arith.constant 0 : index
    %8 = vector.load %arg3[%c0_8, %c0_9] : memref<1x32xf32, #tpu.memory_space<vmem>>, vector<1x32xf32>
    %cst_10 = arith.constant dense<0.000000e+00> : vector<16xf32>
    %9 = vector.multi_reduction <add>, %1, %cst_10 [1] : vector<16x32xf32> to vector<16xf32>
    %10 = vector.shape_cast %9 : vector<16xf32> to vector<16x1xf32>
    %cst_11 = arith.constant 3.200000e+01 : f32
    %11 = vector.broadcast %cst_11 : f32 to vector<16x1xf32>
    %12 = arith.divf %10, %11 : vector<16x1xf32>
    %13 = vector.broadcast %12 : vector<16x1xf32> to vector<16x32xf32>
    %14 = arith.subf %1, %13 : vector<16x32xf32>
    %15 = arith.mulf %14, %14 : vector<16x32xf32>
    %cst_12 = arith.constant dense<0.000000e+00> : vector<16xf32>
    %16 = vector.multi_reduction <add>, %15, %cst_12 [1] : vector<16x32xf32> to vector<16xf32>
    %17 = vector.shape_cast %16 : vector<16xf32> to vector<16x1xf32>
    %cst_13 = arith.constant 3.200000e+01 : f32
    %18 = vector.broadcast %cst_13 : f32 to vector<16x1xf32>
    %19 = arith.divf %17, %18 : vector<16x1xf32>
    %20 = vector.broadcast %12 : vector<16x1xf32> to vector<16x32xf32>
    %21 = arith.subf %1, %20 : vector<16x32xf32>
    %cst_14 = arith.constant 9.99999974E-6 : f32
    %22 = vector.broadcast %cst_14 : f32 to vector<16x1xf32>
    %23 = arith.addf %19, %22 : vector<16x1xf32>
    %24 = math.rsqrt %23 : vector<16x1xf32>
    %25 = vector.broadcast %24 : vector<16x1xf32> to vector<16x32xf32>
    %26 = arith.mulf %21, %25 : vector<16x32xf32>
    %27 = vector.broadcast %7 : vector<1x32xf32> to vector<16x32xf32>
    %28 = arith.mulf %26, %27 : vector<16x32xf32>
    %29 = vector.broadcast %8 : vector<1x32xf32> to vector<16x32xf32>
    %30 = arith.addf %28, %29 : vector<16x32xf32>
    %c0_15 = arith.constant 0 : index
    %c0_16 = arith.constant 0 : index
    %31 = vector.load %arg4[%c0_15, %c0_16] : memref<32x96xf32, #tpu.memory_space<vmem>>, vector<32x96xf32>
    %cst_17 = arith.constant dense<0.000000e+00> : vector<16x96xf32>
    %32 = tpu.matmul %30, %31, %cst_17 {dimension_numbers = #tpu.dot_dimension_numbers<[1], [0], [0], [1], [0, 0, 1, 1], [], []>} : vector<16x32xf32>, vector<32x96xf32>, vector<16x96xf32> -> vector<16x96xf32>
    %c0_18 = arith.constant 0 : index
    %c0_19 = arith.constant 0 : index
    %33 = vector.load %arg5[%c0_18, %c0_19] : memref<1x96xf32, #tpu.memory_space<vmem>>, vector<1x96xf32>
    %34 = vector.broadcast %33 : vector<1x96xf32> to vector<16x96xf32>
    %35 = arith.addf %32, %34 : vector<16x96xf32>
    %36 = vector.extract_strided_slice %35 {offsets = [0, 0], sizes = [16, 32], strides = [1, 1]} : vector<16x96xf32> to vector<16x32xf32>
    %cst_20 = arith.constant 5.000000e-01 : f32
    %37 = vector.broadcast %cst_20 : f32 to vector<16x32xf32>
    %38 = arith.mulf %36, %37 : vector<16x32xf32>
    %39 = vector.extract_strided_slice %35 {offsets = [0, 32], sizes = [16, 32], strides = [1, 1]} : vector<16x96xf32> to vector<16x32xf32>
    %40 = vector.extract_strided_slice %35 {offsets = [0, 64], sizes = [16, 32], strides = [1, 1]} : vector<16x96xf32> to vector<16x32xf32>
    %41 = vector.extract_strided_slice %38 {offsets = [0, 0], sizes = [16, 4], strides = [1, 1]} : vector<16x32xf32> to vector<16x4xf32>
    %42 = vector.shape_cast %41 : vector<16x4xf32> to vector<2x8x4xf32>
    %43 = vector.extract_strided_slice %39 {offsets = [0, 0], sizes = [16, 4], strides = [1, 1]} : vector<16x32xf32> to vector<16x4xf32>
    %44 = vector.shape_cast %43 : vector<16x4xf32> to vector<2x8x4xf32>
    %45 = vector.extract_strided_slice %40 {offsets = [0, 0], sizes = [16, 4], strides = [1, 1]} : vector<16x32xf32> to vector<16x4xf32>
    %46 = vector.shape_cast %45 : vector<16x4xf32> to vector<2x8x4xf32>
    "tpu.trace_start"() <{level = 10 : i32, message = "bqd,bkd->bqk"}> : () -> ()
    %cst_21 = arith.constant dense<0.000000e+00> : vector<2x8x8xf32>
    %47 = tpu.matmul %42, %44, %cst_21 {dimension_numbers = #tpu.dot_dimension_numbers<[2], [2], [1], [1], [0, 0, 0, 1, 1, 1], [0], [0]>} : vector<2x8x4xf32>, vector<2x8x4xf32>, vector<2x8x8xf32> -> vector<2x8x8xf32>
    "tpu.trace_stop"() : () -> ()
    %48 = vector.broadcast %6 : vector<2x1x8xf32> to vector<2x8x8xf32>
    %49 = arith.addf %47, %48 : vector<2x8x8xf32>
    %cst_22 = arith.constant dense<0xFF800000> : vector<2x8xf32>
    %50 = vector.multi_reduction <maximumf>, %49, %cst_22 [2] : vector<2x8x8xf32> to vector<2x8xf32>
    %51 = vector.shape_cast %50 : vector<2x8xf32> to vector<2x8x1xf32>
    %52 = vector.broadcast %51 : vector<2x8x1xf32> to vector<2x8x8xf32>
    %53 = arith.subf %49, %52 : vector<2x8x8xf32>
    %54 = math.exp %53 : vector<2x8x8xf32>
    %cst_23 = arith.constant dense<0.000000e+00> : vector<2x8xf32>
    %55 = vector.multi_reduction <add>, %54, %cst_23 [2] : vector<2x8x8xf32> to vector<2x8xf32>
    %56 = vector.shape_cast %55 : vector<2x8xf32> to vector<2x8x1xf32>
    %57 = tpu.reciprocal %56 {approx = true} : vector<2x8x1xf32> -> vector<2x8x1xf32>
    %58 = vector.broadcast %57 : vector<2x8x1xf32> to vector<2x8x8xf32>
    %59 = arith.mulf %54, %58 : vector<2x8x8xf32>
    "tpu.trace_start"() <{level = 10 : i32, message = "bqk,bkd->bqd"}> : () -> ()
    %cst_24 = arith.constant dense<0.000000e+00> : vector<2x8x4xf32>
    %60 = tpu.matmul %59, %46, %cst_24 {dimension_numbers = #tpu.dot_dimension_numbers<[2], [1], [1], [2], [0, 0, 0, 1, 1, 2], [0], [0]>} : vector<2x8x8xf32>, vector<2x8x4xf32>, vector<2x8x4xf32> -> vector<2x8x4xf32>
    "tpu.trace_stop"() : () -> ()
    %61 = vector.shape_cast %60 : vector<2x8x4xf32> to vector<16x4xf32>
    %62 = vector.extract_strided_slice %38 {offsets = [0, 4], sizes = [16, 4], strides = [1, 1]} : vector<16x32xf32> to vector<16x4xf32>
    %63 = vector.shape_cast %62 : vector<16x4xf32> to vector<2x8x4xf32>
    %64 = vector.extract_strided_slice %39 {offsets = [0, 4], sizes = [16, 4], strides = [1, 1]} : vector<16x32xf32> to vector<16x4xf32>
    %65 = vector.shape_cast %64 : vector<16x4xf32> to vector<2x8x4xf32>
    %66 = vector.extract_strided_slice %40 {offsets = [0, 4], sizes = [16, 4], strides = [1, 1]} : vector<16x32xf32> to vector<16x4xf32>
    %67 = vector.shape_cast %66 : vector<16x4xf32> to vector<2x8x4xf32>
    "tpu.trace_start"() <{level = 10 : i32, message = "bqd,bkd->bqk"}> : () -> ()
    %cst_25 = arith.constant dense<0.000000e+00> : vector<2x8x8xf32>
    %68 = tpu.matmul %63, %65, %cst_25 {dimension_numbers = #tpu.dot_dimension_numbers<[2], [2], [1], [1], [0, 0, 0, 1, 1, 1], [0], [0]>} : vector<2x8x4xf32>, vector<2x8x4xf32>, vector<2x8x8xf32> -> vector<2x8x8xf32>
    "tpu.trace_stop"() : () -> ()
    %69 = vector.broadcast %6 : vector<2x1x8xf32> to vector<2x8x8xf32>
    %70 = arith.addf %68, %69 : vector<2x8x8xf32>
    %cst_26 = arith.constant dense<0xFF800000> : vector<2x8xf32>
    %71 = vector.multi_reduction <maximumf>, %70, %cst_26 [2] : vector<2x8x8xf32> to vector<2x8xf32>
    %72 = vector.shape_cast %71 : vector<2x8xf32> to vector<2x8x1xf32>
    %73 = vector.broadcast %72 : vector<2x8x1xf32> to vector<2x8x8xf32>
    %74 = arith.subf %70, %73 : vector<2x8x8xf32>
    %75 = math.exp %74 : vector<2x8x8xf32>
    %cst_27 = arith.constant dense<0.000000e+00> : vector<2x8xf32>
    %76 = vector.multi_reduction <add>, %75, %cst_27 [2] : vector<2x8x8xf32> to vector<2x8xf32>
    %77 = vector.shape_cast %76 : vector<2x8xf32> to vector<2x8x1xf32>
    %78 = tpu.reciprocal %77 {approx = true} : vector<2x8x1xf32> -> vector<2x8x1xf32>
    %79 = vector.broadcast %78 : vector<2x8x1xf32> to vector<2x8x8xf32>
    %80 = arith.mulf %75, %79 : vector<2x8x8xf32>
    "tpu.trace_start"() <{level = 10 : i32, message = "bqk,bkd->bqd"}> : () -> ()
    %cst_28 = arith.constant dense<0.000000e+00> : vector<2x8x4xf32>
    %81 = tpu.matmul %80, %67, %cst_28 {dimension_numbers = #tpu.dot_dimension_numbers<[2], [1], [1], [2], [0, 0, 0, 1, 1, 2], [0], [0]>} : vector<2x8x8xf32>, vector<2x8x4xf32>, vector<2x8x4xf32> -> vector<2x8x4xf32>
    "tpu.trace_stop"() : () -> ()
    %82 = vector.shape_cast %81 : vector<2x8x4xf32> to vector<16x4xf32>
    %83 = vector.extract_strided_slice %38 {offsets = [0, 8], sizes = [16, 4], strides = [1, 1]} : vector<16x32xf32> to vector<16x4xf32>
    %84 = vector.shape_cast %83 : vector<16x4xf32> to vector<2x8x4xf32>
    %85 = vector.extract_strided_slice %39 {offsets = [0, 8], sizes = [16, 4], strides = [1, 1]} : vector<16x32xf32> to vector<16x4xf32>
    %86 = vector.shape_cast %85 : vector<16x4xf32> to vector<2x8x4xf32>
    %87 = vector.extract_strided_slice %40 {offsets = [0, 8], sizes = [16, 4], strides = [1, 1]} : vector<16x32xf32> to vector<16x4xf32>
    %88 = vector.shape_cast %87 : vector<16x4xf32> to vector<2x8x4xf32>
    "tpu.trace_start"() <{level = 10 : i32, message = "bqd,bkd->bqk"}> : () -> ()
    %cst_29 = arith.constant dense<0.000000e+00> : vector<2x8x8xf32>
    %89 = tpu.matmul %84, %86, %cst_29 {dimension_numbers = #tpu.dot_dimension_numbers<[2], [2], [1], [1], [0, 0, 0, 1, 1, 1], [0], [0]>} : vector<2x8x4xf32>, vector<2x8x4xf32>, vector<2x8x8xf32> -> vector<2x8x8xf32>
    "tpu.trace_stop"() : () -> ()
    %90 = vector.broadcast %6 : vector<2x1x8xf32> to vector<2x8x8xf32>
    %91 = arith.addf %89, %90 : vector<2x8x8xf32>
    %cst_30 = arith.constant dense<0xFF800000> : vector<2x8xf32>
    %92 = vector.multi_reduction <maximumf>, %91, %cst_30 [2] : vector<2x8x8xf32> to vector<2x8xf32>
    %93 = vector.shape_cast %92 : vector<2x8xf32> to vector<2x8x1xf32>
    %94 = vector.broadcast %93 : vector<2x8x1xf32> to vector<2x8x8xf32>
    %95 = arith.subf %91, %94 : vector<2x8x8xf32>
    %96 = math.exp %95 : vector<2x8x8xf32>
    %cst_31 = arith.constant dense<0.000000e+00> : vector<2x8xf32>
    %97 = vector.multi_reduction <add>, %96, %cst_31 [2] : vector<2x8x8xf32> to vector<2x8xf32>
    %98 = vector.shape_cast %97 : vector<2x8xf32> to vector<2x8x1xf32>
    %99 = tpu.reciprocal %98 {approx = true} : vector<2x8x1xf32> -> vector<2x8x1xf32>
    %100 = vector.broadcast %99 : vector<2x8x1xf32> to vector<2x8x8xf32>
    %101 = arith.mulf %96, %100 : vector<2x8x8xf32>
    "tpu.trace_start"() <{level = 10 : i32, message = "bqk,bkd->bqd"}> : () -> ()
    %cst_32 = arith.constant dense<0.000000e+00> : vector<2x8x4xf32>
    %102 = tpu.matmul %101, %88, %cst_32 {dimension_numbers = #tpu.dot_dimension_numbers<[2], [1], [1], [2], [0, 0, 0, 1, 1, 2], [0], [0]>} : vector<2x8x8xf32>, vector<2x8x4xf32>, vector<2x8x4xf32> -> vector<2x8x4xf32>
    "tpu.trace_stop"() : () -> ()
    %103 = vector.shape_cast %102 : vector<2x8x4xf32> to vector<16x4xf32>
    %104 = vector.extract_strided_slice %38 {offsets = [0, 12], sizes = [16, 4], strides = [1, 1]} : vector<16x32xf32> to vector<16x4xf32>
    %105 = vector.shape_cast %104 : vector<16x4xf32> to vector<2x8x4xf32>
    %106 = vector.extract_strided_slice %39 {offsets = [0, 12], sizes = [16, 4], strides = [1, 1]} : vector<16x32xf32> to vector<16x4xf32>
    %107 = vector.shape_cast %106 : vector<16x4xf32> to vector<2x8x4xf32>
    %108 = vector.extract_strided_slice %40 {offsets = [0, 12], sizes = [16, 4], strides = [1, 1]} : vector<16x32xf32> to vector<16x4xf32>
    %109 = vector.shape_cast %108 : vector<16x4xf32> to vector<2x8x4xf32>
    "tpu.trace_start"() <{level = 10 : i32, message = "bqd,bkd->bqk"}> : () -> ()
    %cst_33 = arith.constant dense<0.000000e+00> : vector<2x8x8xf32>
    %110 = tpu.matmul %105, %107, %cst_33 {dimension_numbers = #tpu.dot_dimension_numbers<[2], [2], [1], [1], [0, 0, 0, 1, 1, 1], [0], [0]>} : vector<2x8x4xf32>, vector<2x8x4xf32>, vector<2x8x8xf32> -> vector<2x8x8xf32>
    "tpu.trace_stop"() : () -> ()
    %111 = vector.broadcast %6 : vector<2x1x8xf32> to vector<2x8x8xf32>
    %112 = arith.addf %110, %111 : vector<2x8x8xf32>
    %cst_34 = arith.constant dense<0xFF800000> : vector<2x8xf32>
    %113 = vector.multi_reduction <maximumf>, %112, %cst_34 [2] : vector<2x8x8xf32> to vector<2x8xf32>
    %114 = vector.shape_cast %113 : vector<2x8xf32> to vector<2x8x1xf32>
    %115 = vector.broadcast %114 : vector<2x8x1xf32> to vector<2x8x8xf32>
    %116 = arith.subf %112, %115 : vector<2x8x8xf32>
    %117 = math.exp %116 : vector<2x8x8xf32>
    %cst_35 = arith.constant dense<0.000000e+00> : vector<2x8xf32>
    %118 = vector.multi_reduction <add>, %117, %cst_35 [2] : vector<2x8x8xf32> to vector<2x8xf32>
    %119 = vector.shape_cast %118 : vector<2x8xf32> to vector<2x8x1xf32>
    %120 = tpu.reciprocal %119 {approx = true} : vector<2x8x1xf32> -> vector<2x8x1xf32>
    %121 = vector.broadcast %120 : vector<2x8x1xf32> to vector<2x8x8xf32>
    %122 = arith.mulf %117, %121 : vector<2x8x8xf32>
    "tpu.trace_start"() <{level = 10 : i32, message = "bqk,bkd->bqd"}> : () -> ()
    %cst_36 = arith.constant dense<0.000000e+00> : vector<2x8x4xf32>
    %123 = tpu.matmul %122, %109, %cst_36 {dimension_numbers = #tpu.dot_dimension_numbers<[2], [1], [1], [2], [0, 0, 0, 1, 1, 2], [0], [0]>} : vector<2x8x8xf32>, vector<2x8x4xf32>, vector<2x8x4xf32> -> vector<2x8x4xf32>
    "tpu.trace_stop"() : () -> ()
    %124 = vector.shape_cast %123 : vector<2x8x4xf32> to vector<16x4xf32>
    %125 = vector.extract_strided_slice %38 {offsets = [0, 16], sizes = [16, 4], strides = [1, 1]} : vector<16x32xf32> to vector<16x4xf32>
    %126 = vector.shape_cast %125 : vector<16x4xf32> to vector<2x8x4xf32>
    %127 = vector.extract_strided_slice %39 {offsets = [0, 16], sizes = [16, 4], strides = [1, 1]} : vector<16x32xf32> to vector<16x4xf32>
    %128 = vector.shape_cast %127 : vector<16x4xf32> to vector<2x8x4xf32>
    %129 = vector.extract_strided_slice %40 {offsets = [0, 16], sizes = [16, 4], strides = [1, 1]} : vector<16x32xf32> to vector<16x4xf32>
    %130 = vector.shape_cast %129 : vector<16x4xf32> to vector<2x8x4xf32>
    "tpu.trace_start"() <{level = 10 : i32, message = "bqd,bkd->bqk"}> : () -> ()
    %cst_37 = arith.constant dense<0.000000e+00> : vector<2x8x8xf32>
    %131 = tpu.matmul %126, %128, %cst_37 {dimension_numbers = #tpu.dot_dimension_numbers<[2], [2], [1], [1], [0, 0, 0, 1, 1, 1], [0], [0]>} : vector<2x8x4xf32>, vector<2x8x4xf32>, vector<2x8x8xf32> -> vector<2x8x8xf32>
    "tpu.trace_stop"() : () -> ()
    %132 = vector.broadcast %6 : vector<2x1x8xf32> to vector<2x8x8xf32>
    %133 = arith.addf %131, %132 : vector<2x8x8xf32>
    %cst_38 = arith.constant dense<0xFF800000> : vector<2x8xf32>
    %134 = vector.multi_reduction <maximumf>, %133, %cst_38 [2] : vector<2x8x8xf32> to vector<2x8xf32>
    %135 = vector.shape_cast %134 : vector<2x8xf32> to vector<2x8x1xf32>
    %136 = vector.broadcast %135 : vector<2x8x1xf32> to vector<2x8x8xf32>
    %137 = arith.subf %133, %136 : vector<2x8x8xf32>
    %138 = math.exp %137 : vector<2x8x8xf32>
    %cst_39 = arith.constant dense<0.000000e+00> : vector<2x8xf32>
    %139 = vector.multi_reduction <add>, %138, %cst_39 [2] : vector<2x8x8xf32> to vector<2x8xf32>
    %140 = vector.shape_cast %139 : vector<2x8xf32> to vector<2x8x1xf32>
    %141 = tpu.reciprocal %140 {approx = true} : vector<2x8x1xf32> -> vector<2x8x1xf32>
    %142 = vector.broadcast %141 : vector<2x8x1xf32> to vector<2x8x8xf32>
    %143 = arith.mulf %138, %142 : vector<2x8x8xf32>
    "tpu.trace_start"() <{level = 10 : i32, message = "bqk,bkd->bqd"}> : () -> ()
    %cst_40 = arith.constant dense<0.000000e+00> : vector<2x8x4xf32>
    %144 = tpu.matmul %143, %130, %cst_40 {dimension_numbers = #tpu.dot_dimension_numbers<[2], [1], [1], [2], [0, 0, 0, 1, 1, 2], [0], [0]>} : vector<2x8x8xf32>, vector<2x8x4xf32>, vector<2x8x4xf32> -> vector<2x8x4xf32>
    "tpu.trace_stop"() : () -> ()
    %145 = vector.shape_cast %144 : vector<2x8x4xf32> to vector<16x4xf32>
    %146 = vector.extract_strided_slice %38 {offsets = [0, 20], sizes = [16, 4], strides = [1, 1]} : vector<16x32xf32> to vector<16x4xf32>
    %147 = vector.shape_cast %146 : vector<16x4xf32> to vector<2x8x4xf32>
    %148 = vector.extract_strided_slice %39 {offsets = [0, 20], sizes = [16, 4], strides = [1, 1]} : vector<16x32xf32> to vector<16x4xf32>
    %149 = vector.shape_cast %148 : vector<16x4xf32> to vector<2x8x4xf32>
    %150 = vector.extract_strided_slice %40 {offsets = [0, 20], sizes = [16, 4], strides = [1, 1]} : vector<16x32xf32> to vector<16x4xf32>
    %151 = vector.shape_cast %150 : vector<16x4xf32> to vector<2x8x4xf32>
    "tpu.trace_start"() <{level = 10 : i32, message = "bqd,bkd->bqk"}> : () -> ()
    %cst_41 = arith.constant dense<0.000000e+00> : vector<2x8x8xf32>
    %152 = tpu.matmul %147, %149, %cst_41 {dimension_numbers = #tpu.dot_dimension_numbers<[2], [2], [1], [1], [0, 0, 0, 1, 1, 1], [0], [0]>} : vector<2x8x4xf32>, vector<2x8x4xf32>, vector<2x8x8xf32> -> vector<2x8x8xf32>
    "tpu.trace_stop"() : () -> ()
    %153 = vector.broadcast %6 : vector<2x1x8xf32> to vector<2x8x8xf32>
    %154 = arith.addf %152, %153 : vector<2x8x8xf32>
    %cst_42 = arith.constant dense<0xFF800000> : vector<2x8xf32>
    %155 = vector.multi_reduction <maximumf>, %154, %cst_42 [2] : vector<2x8x8xf32> to vector<2x8xf32>
    %156 = vector.shape_cast %155 : vector<2x8xf32> to vector<2x8x1xf32>
    %157 = vector.broadcast %156 : vector<2x8x1xf32> to vector<2x8x8xf32>
    %158 = arith.subf %154, %157 : vector<2x8x8xf32>
    %159 = math.exp %158 : vector<2x8x8xf32>
    %cst_43 = arith.constant dense<0.000000e+00> : vector<2x8xf32>
    %160 = vector.multi_reduction <add>, %159, %cst_43 [2] : vector<2x8x8xf32> to vector<2x8xf32>
    %161 = vector.shape_cast %160 : vector<2x8xf32> to vector<2x8x1xf32>
    %162 = tpu.reciprocal %161 {approx = true} : vector<2x8x1xf32> -> vector<2x8x1xf32>
    %163 = vector.broadcast %162 : vector<2x8x1xf32> to vector<2x8x8xf32>
    %164 = arith.mulf %159, %163 : vector<2x8x8xf32>
    "tpu.trace_start"() <{level = 10 : i32, message = "bqk,bkd->bqd"}> : () -> ()
    %cst_44 = arith.constant dense<0.000000e+00> : vector<2x8x4xf32>
    %165 = tpu.matmul %164, %151, %cst_44 {dimension_numbers = #tpu.dot_dimension_numbers<[2], [1], [1], [2], [0, 0, 0, 1, 1, 2], [0], [0]>} : vector<2x8x8xf32>, vector<2x8x4xf32>, vector<2x8x4xf32> -> vector<2x8x4xf32>
    "tpu.trace_stop"() : () -> ()
    %166 = vector.shape_cast %165 : vector<2x8x4xf32> to vector<16x4xf32>
    %167 = vector.extract_strided_slice %38 {offsets = [0, 24], sizes = [16, 4], strides = [1, 1]} : vector<16x32xf32> to vector<16x4xf32>
    %168 = vector.shape_cast %167 : vector<16x4xf32> to vector<2x8x4xf32>
    %169 = vector.extract_strided_slice %39 {offsets = [0, 24], sizes = [16, 4], strides = [1, 1]} : vector<16x32xf32> to vector<16x4xf32>
    %170 = vector.shape_cast %169 : vector<16x4xf32> to vector<2x8x4xf32>
    %171 = vector.extract_strided_slice %40 {offsets = [0, 24], sizes = [16, 4], strides = [1, 1]} : vector<16x32xf32> to vector<16x4xf32>
    %172 = vector.shape_cast %171 : vector<16x4xf32> to vector<2x8x4xf32>
    "tpu.trace_start"() <{level = 10 : i32, message = "bqd,bkd->bqk"}> : () -> ()
    %cst_45 = arith.constant dense<0.000000e+00> : vector<2x8x8xf32>
    %173 = tpu.matmul %168, %170, %cst_45 {dimension_numbers = #tpu.dot_dimension_numbers<[2], [2], [1], [1], [0, 0, 0, 1, 1, 1], [0], [0]>} : vector<2x8x4xf32>, vector<2x8x4xf32>, vector<2x8x8xf32> -> vector<2x8x8xf32>
    "tpu.trace_stop"() : () -> ()
    %174 = vector.broadcast %6 : vector<2x1x8xf32> to vector<2x8x8xf32>
    %175 = arith.addf %173, %174 : vector<2x8x8xf32>
    %cst_46 = arith.constant dense<0xFF800000> : vector<2x8xf32>
    %176 = vector.multi_reduction <maximumf>, %175, %cst_46 [2] : vector<2x8x8xf32> to vector<2x8xf32>
    %177 = vector.shape_cast %176 : vector<2x8xf32> to vector<2x8x1xf32>
    %178 = vector.broadcast %177 : vector<2x8x1xf32> to vector<2x8x8xf32>
    %179 = arith.subf %175, %178 : vector<2x8x8xf32>
    %180 = math.exp %179 : vector<2x8x8xf32>
    %cst_47 = arith.constant dense<0.000000e+00> : vector<2x8xf32>
    %181 = vector.multi_reduction <add>, %180, %cst_47 [2] : vector<2x8x8xf32> to vector<2x8xf32>
    %182 = vector.shape_cast %181 : vector<2x8xf32> to vector<2x8x1xf32>
    %183 = tpu.reciprocal %182 {approx = true} : vector<2x8x1xf32> -> vector<2x8x1xf32>
    %184 = vector.broadcast %183 : vector<2x8x1xf32> to vector<2x8x8xf32>
    %185 = arith.mulf %180, %184 : vector<2x8x8xf32>
    "tpu.trace_start"() <{level = 10 : i32, message = "bqk,bkd->bqd"}> : () -> ()
    %cst_48 = arith.constant dense<0.000000e+00> : vector<2x8x4xf32>
    %186 = tpu.matmul %185, %172, %cst_48 {dimension_numbers = #tpu.dot_dimension_numbers<[2], [1], [1], [2], [0, 0, 0, 1, 1, 2], [0], [0]>} : vector<2x8x8xf32>, vector<2x8x4xf32>, vector<2x8x4xf32> -> vector<2x8x4xf32>
    "tpu.trace_stop"() : () -> ()
    %187 = vector.shape_cast %186 : vector<2x8x4xf32> to vector<16x4xf32>
    %188 = vector.extract_strided_slice %38 {offsets = [0, 28], sizes = [16, 4], strides = [1, 1]} : vector<16x32xf32> to vector<16x4xf32>
    %189 = vector.shape_cast %188 : vector<16x4xf32> to vector<2x8x4xf32>
    %190 = vector.extract_strided_slice %39 {offsets = [0, 28], sizes = [16, 4], strides = [1, 1]} : vector<16x32xf32> to vector<16x4xf32>
    %191 = vector.shape_cast %190 : vector<16x4xf32> to vector<2x8x4xf32>
    %192 = vector.extract_strided_slice %40 {offsets = [0, 28], sizes = [16, 4], strides = [1, 1]} : vector<16x32xf32> to vector<16x4xf32>
    %193 = vector.shape_cast %192 : vector<16x4xf32> to vector<2x8x4xf32>
    "tpu.trace_start"() <{level = 10 : i32, message = "bqd,bkd->bqk"}> : () -> ()
    %cst_49 = arith.constant dense<0.000000e+00> : vector<2x8x8xf32>
    %194 = tpu.matmul %189, %191, %cst_49 {dimension_numbers = #tpu.dot_dimension_numbers<[2], [2], [1], [1], [0, 0, 0, 1, 1, 1], [0], [0]>} : vector<2x8x4xf32>, vector<2x8x4xf32>, vector<2x8x8xf32> -> vector<2x8x8xf32>
    "tpu.trace_stop"() : () -> ()
    %195 = vector.broadcast %6 : vector<2x1x8xf32> to vector<2x8x8xf32>
    %196 = arith.addf %194, %195 : vector<2x8x8xf32>
    %cst_50 = arith.constant dense<0xFF800000> : vector<2x8xf32>
    %197 = vector.multi_reduction <maximumf>, %196, %cst_50 [2] : vector<2x8x8xf32> to vector<2x8xf32>
    %198 = vector.shape_cast %197 : vector<2x8xf32> to vector<2x8x1xf32>
    %199 = vector.broadcast %198 : vector<2x8x1xf32> to vector<2x8x8xf32>
    %200 = arith.subf %196, %199 : vector<2x8x8xf32>
    %201 = math.exp %200 : vector<2x8x8xf32>
    %cst_51 = arith.constant dense<0.000000e+00> : vector<2x8xf32>
    %202 = vector.multi_reduction <add>, %201, %cst_51 [2] : vector<2x8x8xf32> to vector<2x8xf32>
    %203 = vector.shape_cast %202 : vector<2x8xf32> to vector<2x8x1xf32>
    %204 = tpu.reciprocal %203 {approx = true} : vector<2x8x1xf32> -> vector<2x8x1xf32>
    %205 = vector.broadcast %204 : vector<2x8x1xf32> to vector<2x8x8xf32>
    %206 = arith.mulf %201, %205 : vector<2x8x8xf32>
    "tpu.trace_start"() <{level = 10 : i32, message = "bqk,bkd->bqd"}> : () -> ()
    %cst_52 = arith.constant dense<0.000000e+00> : vector<2x8x4xf32>
    %207 = tpu.matmul %206, %193, %cst_52 {dimension_numbers = #tpu.dot_dimension_numbers<[2], [1], [1], [2], [0, 0, 0, 1, 1, 2], [0], [0]>} : vector<2x8x8xf32>, vector<2x8x4xf32>, vector<2x8x4xf32> -> vector<2x8x4xf32>
    "tpu.trace_stop"() : () -> ()
    %208 = vector.shape_cast %207 : vector<2x8x4xf32> to vector<16x4xf32>
    %209 = tpu.concatenate %61, %82, %103, %124, %145, %166, %187, %208 in 1 : vector<16x4xf32>, vector<16x4xf32>, vector<16x4xf32>, vector<16x4xf32>, vector<16x4xf32>, vector<16x4xf32>, vector<16x4xf32>, vector<16x4xf32> -> vector<16x32xf32>
    %c0_53 = arith.constant 0 : index
    %c0_54 = arith.constant 0 : index
    %210 = vector.load %arg6[%c0_53, %c0_54] : memref<32x32xf32, #tpu.memory_space<vmem>>, vector<32x32xf32>
    %cst_55 = arith.constant dense<0.000000e+00> : vector<16x32xf32>
    %211 = tpu.matmul %209, %210, %cst_55 {dimension_numbers = #tpu.dot_dimension_numbers<[1], [0], [0], [1], [0, 0, 1, 1], [], []>} : vector<16x32xf32>, vector<32x32xf32>, vector<16x32xf32> -> vector<16x32xf32>
    %c0_56 = arith.constant 0 : index
    %c0_57 = arith.constant 0 : index
    %212 = vector.load %arg7[%c0_56, %c0_57] : memref<1x32xf32, #tpu.memory_space<vmem>>, vector<1x32xf32>
    %213 = vector.broadcast %212 : vector<1x32xf32> to vector<16x32xf32>
    %214 = arith.addf %211, %213 : vector<16x32xf32>
    %215 = arith.addf %1, %214 : vector<16x32xf32>
    %c0_58 = arith.constant 0 : index
    %c0_59 = arith.constant 0 : index
    %216 = vector.load %arg8[%c0_58, %c0_59] : memref<1x32xf32, #tpu.memory_space<vmem>>, vector<1x32xf32>
    %c0_60 = arith.constant 0 : index
    %c0_61 = arith.constant 0 : index
    %217 = vector.load %arg9[%c0_60, %c0_61] : memref<1x32xf32, #tpu.memory_space<vmem>>, vector<1x32xf32>
    %cst_62 = arith.constant dense<0.000000e+00> : vector<16xf32>
    %218 = vector.multi_reduction <add>, %215, %cst_62 [1] : vector<16x32xf32> to vector<16xf32>
    %219 = vector.shape_cast %218 : vector<16xf32> to vector<16x1xf32>
    %cst_63 = arith.constant 3.200000e+01 : f32
    %220 = vector.broadcast %cst_63 : f32 to vector<16x1xf32>
    %221 = arith.divf %219, %220 : vector<16x1xf32>
    %222 = vector.broadcast %221 : vector<16x1xf32> to vector<16x32xf32>
    %223 = arith.subf %215, %222 : vector<16x32xf32>
    %224 = arith.mulf %223, %223 : vector<16x32xf32>
    %cst_64 = arith.constant dense<0.000000e+00> : vector<16xf32>
    %225 = vector.multi_reduction <add>, %224, %cst_64 [1] : vector<16x32xf32> to vector<16xf32>
    %226 = vector.shape_cast %225 : vector<16xf32> to vector<16x1xf32>
    %cst_65 = arith.constant 3.200000e+01 : f32
    %227 = vector.broadcast %cst_65 : f32 to vector<16x1xf32>
    %228 = arith.divf %226, %227 : vector<16x1xf32>
    %229 = vector.broadcast %221 : vector<16x1xf32> to vector<16x32xf32>
    %230 = arith.subf %215, %229 : vector<16x32xf32>
    %cst_66 = arith.constant 9.99999974E-6 : f32
    %231 = vector.broadcast %cst_66 : f32 to vector<16x1xf32>
    %232 = arith.addf %228, %231 : vector<16x1xf32>
    %233 = math.rsqrt %232 : vector<16x1xf32>
    %234 = vector.broadcast %233 : vector<16x1xf32> to vector<16x32xf32>
    %235 = arith.mulf %230, %234 : vector<16x32xf32>
    %236 = vector.broadcast %216 : vector<1x32xf32> to vector<16x32xf32>
    %237 = arith.mulf %235, %236 : vector<16x32xf32>
    %238 = vector.broadcast %217 : vector<1x32xf32> to vector<16x32xf32>
    %239 = arith.addf %237, %238 : vector<16x32xf32>
    %c0_67 = arith.constant 0 : index
    %c0_68 = arith.constant 0 : index
    %240 = vector.load %arg10[%c0_67, %c0_68] : memref<32x128xf32, #tpu.memory_space<vmem>>, vector<32x128xf32>
    %cst_69 = arith.constant dense<0.000000e+00> : vector<16x128xf32>
    %241 = tpu.matmul %239, %240, %cst_69 {dimension_numbers = #tpu.dot_dimension_numbers<[1], [0], [0], [1], [0, 0, 1, 1], [], []>} : vector<16x32xf32>, vector<32x128xf32>, vector<16x128xf32> -> vector<16x128xf32>
    %c0_70 = arith.constant 0 : index
    %c0_71 = arith.constant 0 : index
    %242 = vector.load %arg11[%c0_70, %c0_71] : memref<1x128xf32, #tpu.memory_space<vmem>>, vector<1x128xf32>
    %243 = vector.broadcast %242 : vector<1x128xf32> to vector<16x128xf32>
    %244 = arith.addf %241, %243 : vector<16x128xf32>
    %cst_72 = arith.constant 0.000000e+00 : f32
    %245 = vector.broadcast %cst_72 : f32 to vector<16x128xf32>
    %246 = arith.maximumf %244, %245 : vector<16x128xf32>
    %c0_73 = arith.constant 0 : index
    %c0_74 = arith.constant 0 : index
    %247 = vector.load %arg12[%c0_73, %c0_74] : memref<128x32xf32, #tpu.memory_space<vmem>>, vector<128x32xf32>
    %cst_75 = arith.constant dense<0.000000e+00> : vector<16x32xf32>
    %248 = tpu.matmul %246, %247, %cst_75 {dimension_numbers = #tpu.dot_dimension_numbers<[1], [0], [0], [1], [0, 0, 1, 1], [], []>} : vector<16x128xf32>, vector<128x32xf32>, vector<16x32xf32> -> vector<16x32xf32>
    %c0_76 = arith.constant 0 : index
    %c0_77 = arith.constant 0 : index
    %249 = vector.load %arg13[%c0_76, %c0_77] : memref<1x32xf32, #tpu.memory_space<vmem>>, vector<1x32xf32>
    %250 = vector.broadcast %249 : vector<1x32xf32> to vector<16x32xf32>
    %251 = arith.addf %248, %250 : vector<16x32xf32>
    %252 = arith.addf %215, %251 : vector<16x32xf32>
    %253 = vector.shape_cast %252 : vector<16x32xf32> to vector<2x8x32xf32>
    %c0_78 = arith.constant 0 : index
    %c0_79 = arith.constant 0 : index
    %c0_80 = arith.constant 0 : index
    %254 = vector.load %arg14[%c0_78, %c0_79, %c0_80] : memref<2x8x32xf32, #tpu.memory_space<vmem>>, vector<2x8x32xf32>
    tpu.vector_store %arg14[%c0_78, %c0_79, %c0_80], %253 {strides = array<i32>} : memref<2x8x32xf32, #tpu.memory_space<vmem>>, vector<2x8x32xf32>,
    return
  }
}

</mosaic_0001>

<bundles_post_ra>
// kernel: _lambda_.1
= control target key start
LH: loop header
LB: loop body
LE: loop exit
PB: predicated region body
PF: predicated region fallthrough
CT: control target
= control target key end

     0   :  { %19 = vsyncpa [#allocation3], 0  ;;  %s4619_s0 = inlined_call_operand.vmem [shape: f32[2,1,8], index: 0, kind: input, shape index: {}]   ;;  %s4620_s1 = inlined_call_operand.hbm [shape: f32[2,8,32], index: 1, kind: input, shape index: {}]   ;;  %s4621_s2 = inlined_call_operand.vmem [shape: f32[1,32], index: 2, kind: input, shape index: {}, may-alias: {2,8}]   ;;  %s4622_s3 = inlined_call_operand.vmem [shape: f32[1,32], index: 3, kind: input, shape index: {}, may-alias: {3,9}]   ;;  %s4623_s4 = inlined_call_operand.hbm [shape: f32[32,96], index: 4, kind: input, shape index: {}]   ;;  %s4624_s5 = inlined_call_operand.hbm [shape: f32[1,96], index: 5, kind: input, shape index: {}]   ;;  %s4625_s6 = inlined_call_operand.hbm [shape: f32[32,32], index: 6, kind: input, shape index: {}]   ;;  %s4626_s7 = inlined_call_operand.vmem [shape: f32[1,32], index: 7, kind: input, shape index: {}]   ;;  %s4627_s8 = inlined_call_operand.vmem [shape: f32[1,32], index: 8, kind: input, shape index: {}, may-alias: {2,8}]   ;;  %s4628_s9 = inlined_call_operand.vmem [shape: f32[1,32], index: 9, kind: input, shape index: {}, may-alias: {3,9}]   ;;  %s4629_s10 = inlined_call_operand.vmem [shape: f32[32,128], index: 10, kind: input, shape index: {}]   ;;  %s4630_s11 = inlined_call_operand.vmem [shape: f32[1,128], index: 11, kind: input, shape index: {}]   ;;  %s4631_s12 = inlined_call_operand.hbm [shape: f32[128,32], index: 12, kind: input, shape index: {}]   ;;  %s4632_s13 = inlined_call_operand.vmem [shape: f32[1,32], index: 13, kind: input, shape index: {}]   ;;  %s4633_s14 = inlined_call_operand.hbm [shape: f32[2,8,32], index: 14, kind: output, shape index: {}]  }
   0x1   :  { %20 = vsyncpa [#allocation6], 0 }
   0x2   :  { %21 = vsyncpa [#allocation9], 0 }
   0x3   :  { %22 = vsyncpa [#allocation4], 0  ;;  %s4045_s29 = smov [#allocation5]   ;;  %s4046_s15 = smov [#allocation8]  }
   0x4   :  { %s46_s30 = sshll.u32 %s4045_s29, 4  ;;  %s68_s16 = sshll.u32 %s4046_s15, 4  ;;  %s47_s30 = int_to_ptr.vmem [resolvable:$true] %s46_s30  ;;  %s4159_s16 = int_to_ptr.vmem [resolvable:$true] %s68_s16 }
   0x5   :  { %s3905_s19 = scalar_lea.hbm %s4623_s4, 512 }
   0x6   :  { %p3906_p0 = scmp.ne.s32.totalorder %s4623_s4, %s3905_s19  ;;  %p3909_p1 = scmp.lt.u32.totalorder %s3905_s19, %s4623_s4 }
   0x8   :  { %p3911_p2 = pnand %p3909_p1, %p3906_p0 }
   0xa   :  { %3914 = shalt.err (!%p3911_p2)
}
   0xb   :  { %s3915_s24 = scalar_lea.vmem %s47_s30, 512  ;;  %p3920_p4 = scmp.lt.s32.totalorder %s47_s30, %s47_s30 }
   0xc   :  { %p3916_p3 = scmp.ne.s32.totalorder %s47_s30, %s3915_s24  ;;  %p3921_p5 = scmp.lt.s32.totalorder %s3915_s24, %s3915_s24 }
   0xe   :  { %p3922_p6 = por %p3921_p5, %p3920_p4 }
  0x10   :  { %p3923_p7 = pnand %p3922_p6, %p3916_p3 }
  0x12   :  { %3926 = shalt.err (!%p3923_p7)
}
  0x13   :  { %s4047_s25 = smov 128   ;;  %s4048_s26 = smov 8  }
  0x14   :  { %52 = dma.hbm_to_vmem [thread:$0]  %s4623_s4, 512, %s47_s30, [#allocation6], %s4047_s25, %s4047_s25, %s4048_s26  }
  0x15   :  { %s3927_s17 = scalar_lea.hbm %s4625_s6, 512 }
  0x16   :  { %p3928_p8 = scmp.ne.s32.totalorder %s4625_s6, %s3927_s17  ;;  %p3931_p9 = scmp.lt.u32.totalorder %s3927_s17, %s4625_s6 }
  0x18   :  { %p3933_p10 = pnand %p3931_p9, %p3928_p8 }
  0x1a   :  { %3936 = shalt.err (!%p3933_p10)
}
  0x1b   :  { %s3937_s22 = scalar_lea.vmem %s4159_s16, 512  ;;  %p3942_p12 = scmp.lt.s32.totalorder %s4159_s16, %s4159_s16 }
  0x1c   :  { %p3938_p11 = scmp.ne.s32.totalorder %s4159_s16, %s3937_s22  ;;  %p3943_p13 = scmp.lt.s32.totalorder %s3937_s22, %s3937_s22 }
  0x1e   :  { %p3944_p0 = por %p3943_p13, %p3942_p12 }
  0x20   :  { %p3945_p1 = pnand %p3944_p0, %p3938_p11 }
  0x22   :  { %3948 = shalt.err (!%p3945_p1)
}
  0x23   :  { %74 = dma.hbm_to_vmem [thread:$0]  %s4625_s6, 512, %s4159_s16, [#allocation9], %s4047_s25, %s4047_s25, %s4048_s26  }
  0x24   :  { %s4049_s23 = smov [#allocation2]   ;;  %s4050_s27 = smov [#allocation7]  }
  0x25   :  { %s30_s24 = sshll.u32 %s4049_s23, 4  ;;  %s59_s28 = sshll.u32 %s4050_s27, 4  ;;  %s31_s24 = int_to_ptr.vmem [resolvable:$true] %s30_s24  ;;  %s60_s28 = int_to_ptr.vmem [resolvable:$true] %s59_s28 }
  0x26   :  { %s3949_s17 = scalar_lea.hbm %s4620_s1, 256 }
  0x27   :  { %p3950_p2 = scmp.ne.s32.totalorder %s4620_s1, %s3949_s17  ;;  %p3953_p3 = scmp.lt.u32.totalorder %s3949_s17, %s4620_s1 }
  0x29   :  { %p3955_p4 = pnand %p3953_p3, %p3950_p2 }
  0x2b   :  { %3958 = shalt.err (!%p3955_p4)
}
  0x2c   :  { %s3959_s6 = scalar_lea.vmem %s31_s24, 256  ;;  %p3964_p6 = scmp.lt.s32.totalorder %s31_s24, %s31_s24 }
  0x2d   :  { %p3960_p5 = scmp.ne.s32.totalorder %s31_s24, %s3959_s6  ;;  %p3965_p7 = scmp.lt.s32.totalorder %s3959_s6, %s3959_s6 }
  0x2f   :  { %p3966_p8 = por %p3965_p7, %p3964_p6 }
  0x31   :  { %p3967_p9 = pnand %p3966_p8, %p3960_p5 }
  0x33   :  { %3970 = shalt.err (!%p3967_p9)
}
  0x34   :  { %36 = dma.hbm_to_vmem [thread:$0]  %s4620_s1, 256, %s31_s24, [#allocation3], %s4047_s25, %s4047_s25, %s4048_s26  }
  0x35   :  { %s3971_s23 = scalar_lea.hbm %s4624_s5, 16 }
  0x36   :  { %p3972_p10 = scmp.ne.s32.totalorder %s4624_s5, %s3971_s23  ;;  %p3975_p11 = scmp.lt.u32.totalorder %s3971_s23, %s4624_s5 }
  0x38   :  { %p3977_p12 = pnand %p3975_p11, %p3972_p10 }
  0x3a   :  { %3980 = shalt.err (!%p3977_p12)
}
  0x3b   :  { %s3981_s18 = scalar_lea.vmem %s60_s28, 16  ;;  %s3985_s19 = scalar_lea.vmem %s60_s28, 32 }
  0x3c   :  { %p3982_p13 = scmp.ne.s32.totalorder %s60_s28, %s3981_s18  ;;  %p3986_p0 = scmp.lt.s32.totalorder %s60_s28, %s60_s28 }
  0x3d   :  { %p3987_p1 = scmp.lt.s32.totalorder %s3985_s19, %s3981_s18 }
  0x3f   :  { %p3988_p2 = por %p3987_p1, %p3986_p0 }
  0x41   :  { %p3989_p3 = pnand %p3988_p2, %p3982_p13 }
  0x43   :  { %3992 = shalt.err (!%p3989_p3)
}
  0x44   :  { %62 = dma.hbm_to_vmem [thread:$0]  %s4624_s5, 16, %s60_s28, [#allocation6]  }
  0x45   :  { %s4051_s20 = smov [#allocation10]   ;;  %s3993_s22 = scalar_lea.hbm %s4631_s12, 2048 }
  0x46   :  { %s90_s21 = sshll.u32 %s4051_s20, 4  ;;  %p3994_p4 = scmp.ne.s32.totalorder %s4631_s12, %s3993_s22  ;;  %s91_s21 = int_to_ptr.vmem [resolvable:$true] %s90_s21 }
  0x47   :  { %p3997_p5 = scmp.lt.u32.totalorder %s3993_s22, %s4631_s12 }
  0x49   :  { %p3999_p6 = pnand %p3997_p5, %p3994_p4 }
  0x4b   :  { %4002 = shalt.err (!%p3999_p6)
}
  0x4c   :  { %s4003_s29 = scalar_lea.vmem %s91_s21, 2048  ;;  %p4008_p8 = scmp.lt.s32.totalorder %s91_s21, %s91_s21 }
  0x4d   :  { %p4004_p7 = scmp.ne.s32.totalorder %s91_s21, %s4003_s29  ;;  %p4009_p9 = scmp.lt.s32.totalorder %s4003_s29, %s4003_s29 }
  0x4f   :  { %p4010_p10 = por %p4009_p9, %p4008_p8 }
  0x51   :  { %p4011_p11 = pnand %p4010_p10, %p4004_p7 }
  0x53   :  { %4014 = shalt.err (!%p4011_p11)
}
  0x54   :  { %96 = dma.hbm_to_vmem [thread:$0]  %s4631_s12, 2048, %s91_s21, [#allocation9], %s4047_s25, %s4047_s25, %s4048_s26  }
  0x55   :  { %4037 = dma.done.wait [#allocation3], 256  }
  0x56   :  { %4038 = vsyncadd [#allocation3], 4294967040 }
  0x57   :  { %4039 = dma.done.wait [#allocation6], 528  }
  0x58   :  { %4040 = vsyncadd [#allocation6], 4294966768 }
  0x59   :  { %4041 = dma.done.wait [#allocation9], 2560  }
  0x5a   :  { %4042 = vsyncadd [#allocation9], 4294964736  ;;  %vm124_vm0 = vcmask 261120   ;;  %v114_v0 = vld [vmem:[#allocation2] sm:$0xff]  ;;  %v115_v1 = vld [vmem:[#allocation2 + $0x8] sm:$0xff]  ;;  %v4052_v36 = vmov 0.0   ;;  %v264_v46 = vlaneseq }
  0x5b   :  { %v125_v2 = vsel %vm124_vm0, %v114_v0, 0.0  ;;  %v128_v3 = vsel %vm124_vm0, %v115_v1, 0.0  ;;  %v168_v14 = vld [vmem:[#allocation5] sm:$0xff]  ;;  %v169_v15 = vld [vmem:[#allocation5 + $0x8] sm:$0xff]  ;;  %v170_v16 = vld [vmem:[#allocation5 + $0x10] sm:$0xff]  ;;  %3529 = vmatprep.subr.mxu0 %v4052_v36  ;;  %vm4053_vm1 = vmmov 0  }
  0x5c   :  { %126 = vadd.xlane.f32.xlu0 %v125_v2  ;;  %v3736_v17 = vpack.c.bf16 %v169_v15, %v168_v14  ;;  %v171_v18 = vld [vmem:[#allocation5 + $0x18] sm:$0xff]  ;;  %v3346_v27 = vld [vmem:[%s4621_s2] ss:$0 sm:$0xff]  ;;  %3531 = vmatprep.mubr.msk.f32.mxu0 %vm4053_vm1, %v4052_v36  ;;  %v3348_v37 = vld [vmem:[#allocation7] ss:$0 sm:$0xff]  ;;  %s4054_s2 = smov 96  }
  0x5d   :  { %v3740_v19 = vpack.c.bf16 %v171_v18, %v170_v16  ;;  %v3347_v29 = vld [vmem:[%s4622_s3] ss:$0 sm:$0xff]  ;;  %vm277_vm2 = vcmask 31744   ;;  %v265_v49 = vshrl.u32 %v264_v46, 7  ;;  %v117_v50 = vld [vmem:[%s4619_s0 + $0x1] sm:$0x1] }
  0x5e   :  { %3737 = vmatprep.subr.bf16.mxu1 %v3736_v17  ;;  %v116_v47 = vld [vmem:[%s4619_s0] sm:$0x1]  ;;  %v3345_v53 = vadd.f32 -1.0, %v117_v50  ;;  %vm431_vm3 = vcmask 64512   ;;  %s4055_s0 = smov 64   ;;  %s4056_s20 = smov 92  }
  0x5f   :  { %3739 = vmatpush3.bf16.msra.mxu1 %v3736_v17  ;;  %v3344_v48 = vadd.f32 -1.0, %v116_v47  ;;  %v266_v52 = vsub.s32 0, %v265_v49  ;;  %s4057_s21 = smov 124   ;;  %s4058_s6 = smov 60   ;;  %vm2976_vm4 = vcmask 97280   ;;  %vm2979_vm5 = vcmask 130048  }
  0x60   :  { %129 = vadd.xlane.f32.xlu0 %v128_v3  ;;  %3741 = vmatprep.subr.bf16.mxu1 %v3740_v19  ;;  %v121_v55 = vmul.f32 1e+09, %v3345_v53  ;;  %s4059_s16 = smov 88   ;;  %s4060_s22 = smov 120   ;;  %vm2982_vm6 = vcmask 162816   ;;  %vm2988_vm7 = vcmask 228352  }
  0x61   :  { %v120_v51 = vmul.f32 1e+09, %v3344_v48  ;;  %s4061_s4 = smov 56   ;;  %s4062_s30 = smov 84   ;;  %vm2985_vm8 = vcmask 195584  }
  0x62   :  { %v4289_v59 = vrot.slane %v121_v55, %v266_v52  ;;  %s4063_s23 = smov 116   ;;  %s4064_s27 = smov 52  }
  0x63   :  { %3743 = vmatpush3.bf16.msra.mxu1 %v3740_v19  ;;  %v4286_v54 = vrot.slane %v120_v51, %v266_v52  ;;  %s4065_s29 = smov 80   ;;  %s4066_s5 = smov 112  }
  0x64   :  { %3519 = vmatprep.subr.mxu1 %v4052_v36  ;;  %s4067_s28 = smov 48   ;;  %s4068_s12 = smov 76  }
  0x65   :  { %s4069_s15 = smov 108   ;;  %s4070_s17 = smov 44  }
  0x66   :  { %s4071_s18 = smov 72   ;;  %s4073_s3 = smov 40  }
  0x67   :  { %s4074_s19 = smov 68   ;;  %s4075_s1 = smov 100  }
  0x68   :  { %s4076_s24 = smov 36  }
  0xe9   :  { %v127_v4 = vpop.xlane.xlu0 %126 }
  0xea   :  { %v132_v5 = vmul.f32 0.03125, %v127_v4 }
  0xec   :  { %v134_v6 = vsub.f32 %v114_v0, %v132_v5 }
  0xed   :  { %v130_v7 = vpop.xlane.xlu0 %129 }
  0xee   :  { %v133_v8 = vmul.f32 0.03125, %v130_v7  ;;  %v136_v9 = vmul.f32 %v134_v6, %v134_v6 }
  0xf0   :  { %v135_v10 = vsub.f32 %v115_v1, %v133_v8  ;;  %v138_v11 = vsel %vm124_vm0, %v136_v9, 0.0 }
  0xf1   :  { %139 = vadd.xlane.f32.xlu1 %v138_v11 }
  0xf2   :  { %v137_v12 = vmul.f32 %v135_v10, %v135_v10 }
  0xf4   :  { %v141_v13 = vsel %vm124_vm0, %v137_v12, 0.0 }
  0xf5   :  { %142 = vadd.xlane.f32.xlu1 %v141_v13 }
 0x17e   :  { %v140_v20 = vpop.xlane.xlu1 %139 }
 0x17f   :  { %v144_v21 = vmul.f32 0.03125, %v140_v20 }
 0x181   :  { %v146_v22 = vadd.f32 1e-05, %v144_v21 }
 0x182   :  { %v143_v23 = vpop.xlane.xlu1 %142 }
 0x183   :  { %3831 = vrsqrt.f32 %v146_v22  ;;  %v145_v24 = vmul.f32 0.03125, %v143_v23 }
 0x185   :  { %v147_v25 = vadd.f32 1e-05, %v145_v24 }
 0x187   :  { %3833 = vrsqrt.f32 %v147_v25 }
 0x18d   :  { %v3832_v26 = vpop.eup %3831 }
 0x18e   :  { %v150_v28 = vmul.f32 %v3832_v26, %v134_v6 }
 0x190   :  { %v158_v30 = vmul.f32 %v3346_v27, %v150_v28 }
 0x191   :  { %v3834_v31 = vpop.eup %3833 }
 0x192   :  { %v151_v32 = vmul.f32 %v3834_v31, %v135_v10  ;;  %v166_v33 = vadd.f32 %v3347_v29, %v158_v30 }
 0x194   :  { %v159_v34 = vmul.f32 %v3346_v27, %v151_v32  ;;  %3516 = vmatprep.mubr.msk.f32.mxu1 %vm124_vm0, %v166_v33 }
 0x196   :  { %v167_v35 = vadd.f32 %v3347_v29, %v159_v34 }
 0x198   :  { %3517 = vmatmul.mubr.msk.f32.vlgmr.msra.gmra.mrb[0].mxu1 %vm124_vm0, %v167_v35 }
 0x199   :  { %3521 = vmatprep.mubr.msk.f32.mxu1 %vm4053_vm1, %v4052_v36 }
 0x26b   :  { %v3518_v38 = vpop.f32.mrb[0].mxu1 }
 0x26c   :  { %v4256_v39 = vadd.f32 %v3518_v38, %v3348_v37  ;;  %v251_v40 = vpop.f32.mrb[1].mxu1 }
 0x26d   :  { %v4258_v41 = vadd.f32 %v3348_v37, %v251_v40 }
 0x26e   :  { %354 = vrot.lane.b32.xlu1 %v4256_v39, %s4054_s2  ;;  %v4273_v45 = vmul.f32 0.5, %v4256_v39 }
 0x26f   :  { %275 = vrot.lane.b32.xlu0 %v4258_v41, %s4054_s2  ;;  %v4264_v43 = vmul.f32 0.5, %v4258_v41  ;;  %s4072_s2 = smov 104  }
 0x2e0   :  { %v355_v44 = vpop.permute.xlu1 %354 }
 0x2e1   :  { %v276_v42 = vpop.permute.xlu0 %275 }
 0x2e2   :  { %3520 = vmatpush3.xpose.msk.msra.mxu1 %vm277_vm2, %v276_v42 }
 0x2e3   :  { %3524 = vmatprep.subr.mxu1 %v4052_v36 }
 0x2e5   :  { %3522 = vmatmul.mubr.msk.f32.vlgmr.msra.gmra.mrb[2].mxu1 %vm277_vm2, %v4264_v43 }
 0x2e6   :  { %3525 = vmatpush3.xpose.msk.msra.mxu1 %vm277_vm2, %v355_v44  ;;  %3526 = vmatprep.mubr.msk.f32.mxu1 %vm4053_vm1, %v4052_v36 }
 0x2e7   :  { %3534 = vmatprep.subr.mxu1 %v4052_v36 }
 0x2e9   :  { %3527 = vmatmul.mubr.msk.f32.vlgmr.msra.gmra.mrb[4].mxu1 %vm277_vm2, %v4273_v45 }
 0x2ea   :  { %3536 = vmatprep.mubr.msk.f32.mxu1 %vm4053_vm1, %v4052_v36 }
 0x3b8   :  { %v349_v56 = vpop.f32.mrb[2].mxu1 }
 0x3b9   :  { %v350_v57 = vadd.f32 %v349_v56, %v4286_v54  ;;  %v3523_v58 = vpop.f32.mrb[3].mxu1 }
 0x3bb   :  { %v432_v60 = vsel %vm431_vm3, %v350_v57, -inf }
 0x3bc   :  { %433 = vmax.xlane.f32.xlu1 %v432_v60  ;;  %v427_v61 = vpop.f32.mrb[4].mxu1 }
 0x3bd   :  { %v428_v62 = vadd.f32 %v427_v61, %v4289_v59  ;;  %v3528_v63 = vpop.f32.mrb[5].mxu1 }
 0x3bf   :  { %v435_v0 = vsel %vm431_vm3, %v428_v62, -inf }
 0x3c0   :  { %436 = vmax.xlane.f32.xlu0 %v435_v0 }
 0x3cd   :  { %530 = vrot.lane.b32.xlu1 %v4256_v39, %s4055_s0 }
 0x3d1   :  { %608 = vrot.lane.b32.xlu1 %v4258_v41, %s4056_s20 }
 0x3d5   :  { %686 = vrot.lane.b32.xlu1 %v4256_v39, %s4056_s20  ;;  %s4078_s20 = smov 12  }
 0x3d6   :  { %454 = vrot.lane.b32.xlu0 %v4258_v41, %s4055_s0  ;;  %s4077_s0 = smov 4  }
 0x449   :  { %v434_v1 = vpop.xlane.xlu1 %433 }
 0x44a   :  { %v438_v2 = vsub.f32 %v350_v57, %v434_v1 }
 0x44c   :  { %v440_v3 = vmul.f32 1.442695, %v438_v2 }
 0x44d   :  { %v531_v4 = vpop.permute.xlu1 %530  ;;  %v437_v5 = vpop.xlane.xlu0 %436 }
 0x44e   :  { %3835 = vpow2.f32 %v440_v3  ;;  %v439_v6 = vsub.f32 %v428_v62, %v437_v5  ;;  %3535 = vmatpush3.msra.mxu1 %v531_v4 }
 0x44f   :  { %3544 = vmatprep.subr.mxu1 %v4052_v36 }
 0x450   :  { %v442_v7 = vmul.f32 1.442695, %v439_v6 }
 0x451   :  { %v455_v8 = vpop.permute.xlu0 %454  ;;  %v609_v13 = vpop.permute.xlu1 %608 }
 0x452   :  { %3837 = vpow2.f32 %v442_v7  ;;  %3530 = vmatpush3.msra.mxu0 %v455_v8 }
 0x453   :  { %3539 = vmatprep.subr.mxu0 %v4052_v36 }
 0x455   :  { %v687_v14 = vpop.permute.xlu1 %686 }
 0x458   :  { %v3836_v9 = vpop.eup %3835 }
 0x459   :  { %v444_v10 = vsel %vm431_vm3, %v3836_v9, 0.0 }
 0x45a   :  { %445 = vadd.xlane.f32.xlu0 %v444_v10 }
 0x45c   :  { %v3838_v11 = vpop.eup %3837 }
 0x45d   :  { %v447_v12 = vsel %vm431_vm3, %v3838_v11, 0.0 }
 0x45e   :  { %448 = vadd.xlane.f32.xlu1 %v447_v12 }
 0x46f   :  { %684 = vrot.lane.b32.xlu1 %v4273_v45, %s4057_s21 }
 0x470   :  { %606 = vrot.lane.b32.xlu0 %v4264_v43, %s4057_s21  ;;  %s4079_s21 = smov 16  }
 0x4e7   :  { %v446_v15 = vpop.xlane.xlu0 %445 }
 0x4e8   :  { %3839 = vrcp.f32 %v446_v15 }
 0x4eb   :  { %v449_v16 = vpop.xlane.xlu1 %448  ;;  %v607_v21 = vpop.permute.xlu0 %606 }
 0x4ec   :  { %3841 = vrcp.f32 %v449_v16 }
 0x4ef   :  { %v685_v22 = vpop.permute.xlu1 %684 }
 0x4f2   :  { %v3840_v17 = vpop.eup %3839 }
 0x4f3   :  { %v452_v18 = vmul.f32 %v3840_v17, %v3836_v9 }
 0x4f5   :  { %3532 = vmatmul.mubr.msk.f32.vlgmr.msra.gmra.mrb[0].mxu0 %vm431_vm3, %v452_v18 }
 0x4f6   :  { %v3842_v19 = vpop.eup %3841  ;;  %3540 = vmatpush3.xpose.msk.msra.mxu0 %vm277_vm2, %v609_v13  ;;  %3541 = vmatprep.mubr.msk.f32.mxu0 %vm4053_vm1, %v4052_v36 }
 0x4f7   :  { %v453_v20 = vmul.f32 %v3842_v19, %v3838_v11  ;;  %3549 = vmatprep.subr.mxu0 %v4052_v36 }
 0x4f9   :  { %3537 = vmatmul.mubr.msk.f32.vlgmr.msra.gmra.mrb[6].mxu1 %vm431_vm3, %v453_v20  ;;  %3542 = vmatmul.mubr.msk.f32.vlgmr.msra.gmra.mrb[2].mxu0 %vm277_vm2, %v607_v21 }
 0x4fa   :  { %3545 = vmatpush3.xpose.msk.msra.mxu1 %vm277_vm2, %v687_v14  ;;  %3546 = vmatprep.mubr.msk.f32.mxu1 %vm4053_vm1, %v4052_v36 }
 0x4fb   :  { %3554 = vmatprep.subr.mxu1 %v4052_v36  ;;  %3551 = vmatprep.mubr.msk.f32.mxu0 %vm4053_vm1, %v4052_v36 }
 0x4fd   :  { %3547 = vmatmul.mubr.msk.f32.vlgmr.msra.gmra.mrb[8].mxu1 %vm277_vm2, %v685_v22 }
 0x4fe   :  { %3556 = vmatprep.mubr.msk.f32.mxu1 %vm4053_vm1, %v4052_v36 }
 0x5c8   :  { %v4320_v23 = vpop.f32.mrb[0].mxu0 }
 0x5c9   :  { %v3533_v24 = vpop.f32.mrb[1].mxu0 }
 0x5cc   :  { %v4322_v25 = vpop.f32.mrb[6].mxu1  ;;  %v680_v26 = vpop.f32.mrb[2].mxu0 }
 0x5cd   :  { %v681_v27 = vadd.f32 %v680_v26, %v4286_v54  ;;  %v3538_v28 = vpop.f32.mrb[7].mxu1  ;;  %v3543_v29 = vpop.f32.mrb[3].mxu0 }
 0x5cf   :  { %v762_v30 = vsel %vm431_vm3, %v681_v27, -inf }
 0x5d0   :  { %763 = vmax.xlane.f32.xlu0 %v762_v30  ;;  %v758_v31 = vpop.f32.mrb[8].mxu1 }
 0x5d1   :  { %v759_v32 = vadd.f32 %v758_v31, %v4289_v59  ;;  %v3548_v33 = vpop.f32.mrb[9].mxu1 }
 0x5d3   :  { %v765_v34 = vsel %vm431_vm3, %v759_v32, -inf }
 0x5d4   :  { %766 = vmax.xlane.f32.xlu1 %v765_v34 }
 0x5e5   :  { %860 = vrot.lane.b32.xlu1 %v4256_v39, %s4058_s6 }
 0x5e6   :  { %784 = vrot.lane.b32.xlu0 %v4258_v41, %s4058_s6  ;;  %s4080_s6 = smov 20  }
 0x5e9   :  { %938 = vrot.lane.b32.xlu1 %v4258_v41, %s4059_s16 }
 0x5ed   :  { %1016 = vrot.lane.b32.xlu1 %v4256_v39, %s4059_s16  ;;  %s4081_s16 = smov 24  }
 0x5f1   :  { %1014 = vrot.lane.b32.xlu1 %v4273_v45, %s4060_s22 }
 0x65d   :  { %v764_v35 = vpop.xlane.xlu0 %763 }
 0x65e   :  { %v768_v37 = vsub.f32 %v681_v27, %v764_v35 }
 0x660   :  { %v770_v38 = vmul.f32 1.442695, %v768_v37 }
 0x661   :  { %v785_v40 = vpop.permute.xlu0 %784  ;;  %v767_v42 = vpop.xlane.xlu1 %766 }
 0x662   :  { %3843 = vpow2.f32 %v770_v38  ;;  %v769_v44 = vsub.f32 %v759_v32, %v767_v42  ;;  %3550 = vmatpush3.msra.mxu0 %v785_v40 }
 0x663   :  { %3559 = vmatprep.subr.mxu0 %v4052_v36 }
 0x664   :  { %v772_v46 = vmul.f32 1.442695, %v769_v44 }
 0x665   :  { %v861_v47 = vpop.permute.xlu1 %860 }
 0x666   :  { %3845 = vpow2.f32 %v772_v46  ;;  %3555 = vmatpush3.msra.mxu1 %v861_v47 }
 0x667   :  { %3564 = vmatprep.subr.mxu1 %v4052_v36 }
 0x669   :  { %v939_v55 = vpop.permute.xlu1 %938 }
 0x66c   :  { %v3844_v48 = vpop.eup %3843 }
 0x66d   :  { %v774_v49 = vsel %vm431_vm3, %v3844_v48, 0.0  ;;  %v1017_v60 = vpop.permute.xlu1 %1016 }
 0x66e   :  { %775 = vadd.xlane.f32.xlu0 %v774_v49 }
 0x670   :  { %v3846_v50 = vpop.eup %3845 }
 0x671   :  { %v777_v51 = vsel %vm431_vm3, %v3846_v50, 0.0  ;;  %v1015_v63 = vpop.permute.xlu1 %1014 }
 0x672   :  { %778 = vadd.xlane.f32.xlu0 %v777_v51 }
 0x688   :  { %936 = vrot.lane.b32.xlu0 %v4264_v43, %s4060_s22  ;;  %s4082_s22 = smov 28  }
 0x6fb   :  { %v776_v52 = vpop.xlane.xlu0 %775 }
 0x6fc   :  { %3847 = vrcp.f32 %v776_v52 }
 0x6ff   :  { %v779_v53 = vpop.xlane.xlu0 %778 }
 0x700   :  { %3849 = vrcp.f32 %v779_v53 }
 0x703   :  { %v937_v62 = vpop.permute.xlu0 %936 }
 0x706   :  { %v3848_v56 = vpop.eup %3847 }
 0x707   :  { %v782_v57 = vmul.f32 %v3848_v56, %v3844_v48 }
 0x709   :  { %3552 = vmatmul.mubr.msk.f32.vlgmr.msra.gmra.mrb[4].mxu0 %vm431_vm3, %v782_v57 }
 0x70a   :  { %v3850_v58 = vpop.eup %3849  ;;  %3560 = vmatpush3.xpose.msk.msra.mxu0 %vm277_vm2, %v939_v55  ;;  %3561 = vmatprep.mubr.msk.f32.mxu0 %vm4053_vm1, %v4052_v36 }
 0x70b   :  { %v783_v61 = vmul.f32 %v3850_v58, %v3846_v50  ;;  %3569 = vmatprep.subr.mxu0 %v4052_v36 }
 0x70d   :  { %3557 = vmatmul.mubr.msk.f32.vlgmr.msra.gmra.mrb[10].mxu1 %vm431_vm3, %v783_v61  ;;  %3562 = vmatmul.mubr.msk.f32.vlgmr.msra.gmra.mrb[6].mxu0 %vm277_vm2, %v937_v62 }
 0x70e   :  { %3565 = vmatpush3.xpose.msk.msra.mxu1 %vm277_vm2, %v1017_v60  ;;  %3566 = vmatprep.mubr.msk.f32.mxu1 %vm4053_vm1, %v4052_v36 }
 0x70f   :  { %3574 = vmatprep.subr.mxu1 %v4052_v36  ;;  %3571 = vmatprep.mubr.msk.f32.mxu0 %vm4053_vm1, %v4052_v36 }
 0x711   :  { %3567 = vmatmul.mubr.msk.f32.vlgmr.msra.gmra.mrb[12].mxu1 %vm277_vm2, %v1015_v63 }
 0x712   :  { %3576 = vmatprep.mubr.msk.f32.mxu1 %vm4053_vm1, %v4052_v36 }
 0x7dc   :  { %v4354_v0 = vpop.f32.mrb[4].mxu0 }
 0x7dd   :  { %v3553_v1 = vpop.f32.mrb[5].mxu0 }
 0x7e0   :  { %v4356_v2 = vpop.f32.mrb[10].mxu1  ;;  %v1010_v3 = vpop.f32.mrb[6].mxu0 }
 0x7e1   :  { %v1011_v4 = vadd.f32 %v1010_v3, %v4286_v54  ;;  %v3558_v5 = vpop.f32.mrb[11].mxu1  ;;  %v3563_v6 = vpop.f32.mrb[7].mxu0 }
 0x7e3   :  { %v1092_v7 = vsel %vm431_vm3, %v1011_v4, -inf }
 0x7e4   :  { %1093 = vmax.xlane.f32.xlu0 %v1092_v7  ;;  %v1088_v8 = vpop.f32.mrb[12].mxu1 }
 0x7e5   :  { %v1089_v9 = vadd.f32 %v1088_v8, %v4289_v59  ;;  %v3568_v10 = vpop.f32.mrb[13].mxu1 }
 0x7e7   :  { %v1095_v11 = vsel %vm431_vm3, %v1089_v9, -inf }
 0x7e8   :  { %1096 = vmax.xlane.f32.xlu1 %v1095_v11 }
 0x7f9   :  { %1190 = vrot.lane.b32.xlu1 %v4256_v39, %s4061_s4 }
 0x7fa   :  { %1114 = vrot.lane.b32.xlu0 %v4258_v41, %s4061_s4 }
 0x7fd   :  { %1268 = vrot.lane.b32.xlu1 %v4258_v41, %s4062_s30 }
 0x801   :  { %1346 = vrot.lane.b32.xlu1 %v4256_v39, %s4062_s30 }
 0x805   :  { %1344 = vrot.lane.b32.xlu1 %v4273_v45, %s4063_s23 }
 0x871   :  { %v1094_v12 = vpop.xlane.xlu0 %1093 }
 0x872   :  { %v1098_v13 = vsub.f32 %v1011_v4, %v1094_v12 }
 0x874   :  { %v1100_v14 = vmul.f32 1.442695, %v1098_v13 }
 0x875   :  { %v1115_v15 = vpop.permute.xlu0 %1114  ;;  %v1097_v16 = vpop.xlane.xlu1 %1096 }
 0x876   :  { %3851 = vpow2.f32 %v1100_v14  ;;  %v1099_v17 = vsub.f32 %v1089_v9, %v1097_v16  ;;  %3570 = vmatpush3.msra.mxu0 %v1115_v15 }
 0x877   :  { %3579 = vmatprep.subr.mxu0 %v4052_v36 }
 0x878   :  { %v1102_v18 = vmul.f32 1.442695, %v1099_v17 }
 0x879   :  { %v1191_v19 = vpop.permute.xlu1 %1190 }
 0x87a   :  { %3853 = vpow2.f32 %v1102_v18  ;;  %3575 = vmatpush3.msra.mxu1 %v1191_v19 }
 0x87b   :  { %3584 = vmatprep.subr.mxu1 %v4052_v36 }
 0x87d   :  { %v1269_v28 = vpop.permute.xlu1 %1268 }
 0x880   :  { %v3852_v20 = vpop.eup %3851 }
 0x881   :  { %v1104_v21 = vsel %vm431_vm3, %v3852_v20, 0.0  ;;  %v1347_v32 = vpop.permute.xlu1 %1346 }
 0x882   :  { %1105 = vadd.xlane.f32.xlu0 %v1104_v21 }
 0x884   :  { %v3854_v22 = vpop.eup %3853 }
 0x885   :  { %v1107_v24 = vsel %vm431_vm3, %v3854_v22, 0.0  ;;  %v1345_v35 = vpop.permute.xlu1 %1344 }
 0x886   :  { %1108 = vadd.xlane.f32.xlu0 %v1107_v24 }
 0x89c   :  { %1266 = vrot.lane.b32.xlu0 %v4264_v43, %s4063_s23 }
 0x90f   :  { %v1106_v26 = vpop.xlane.xlu0 %1105 }
 0x910   :  { %3855 = vrcp.f32 %v1106_v26 }
 0x913   :  { %v1109_v27 = vpop.xlane.xlu0 %1108 }
 0x914   :  { %3857 = vrcp.f32 %v1109_v27 }
 0x917   :  { %v1267_v34 = vpop.permute.xlu0 %1266 }
 0x91a   :  { %v3856_v29 = vpop.eup %3855 }
 0x91b   :  { %v1112_v30 = vmul.f32 %v3856_v29, %v3852_v20 }
 0x91d   :  { %3572 = vmatmul.mubr.msk.f32.vlgmr.msra.gmra.mrb[8].mxu0 %vm431_vm3, %v1112_v30 }
 0x91e   :  { %v3858_v31 = vpop.eup %3857  ;;  %3580 = vmatpush3.xpose.msk.msra.mxu0 %vm277_vm2, %v1269_v28  ;;  %3581 = vmatprep.mubr.msk.f32.mxu0 %vm4053_vm1, %v4052_v36 }
 0x91f   :  { %v1113_v33 = vmul.f32 %v3858_v31, %v3854_v22  ;;  %3589 = vmatprep.subr.mxu0 %v4052_v36 }
 0x921   :  { %3577 = vmatmul.mubr.msk.f32.vlgmr.msra.gmra.mrb[14].mxu1 %vm431_vm3, %v1113_v33  ;;  %3582 = vmatmul.mubr.msk.f32.vlgmr.msra.gmra.mrb[10].mxu0 %vm277_vm2, %v1267_v34 }
 0x922   :  { %3585 = vmatpush3.xpose.msk.msra.mxu1 %vm277_vm2, %v1347_v32  ;;  %3586 = vmatprep.mubr.msk.f32.mxu1 %vm4053_vm1, %v4052_v36 }
 0x923   :  { %3594 = vmatprep.subr.mxu1 %v4052_v36  ;;  %3591 = vmatprep.mubr.msk.f32.mxu0 %vm4053_vm1, %v4052_v36 }
 0x925   :  { %3587 = vmatmul.mubr.msk.f32.vlgmr.msra.gmra.mrb[16].mxu1 %vm277_vm2, %v1345_v35 }
 0x926   :  { %3596 = vmatprep.mubr.msk.f32.mxu1 %vm4053_vm1, %v4052_v36 }
 0x9f0   :  { %v4388_v37 = vpop.f32.mrb[8].mxu0 }
 0x9f1   :  { %v3573_v38 = vpop.f32.mrb[9].mxu0 }
 0x9f4   :  { %v4390_v40 = vpop.f32.mrb[14].mxu1  ;;  %v1340_v42 = vpop.f32.mrb[10].mxu0 }
 0x9f5   :  { %v1341_v44 = vadd.f32 %v1340_v42, %v4286_v54  ;;  %v3578_v46 = vpop.f32.mrb[15].mxu1  ;;  %v3583_v47 = vpop.f32.mrb[11].mxu0 }
 0x9f7   :  { %v1422_v48 = vsel %vm431_vm3, %v1341_v44, -inf }
 0x9f8   :  { %1423 = vmax.xlane.f32.xlu0 %v1422_v48  ;;  %v1418_v49 = vpop.f32.mrb[16].mxu1 }
 0x9f9   :  { %v1419_v50 = vadd.f32 %v1418_v49, %v4289_v59  ;;  %v3588_v51 = vpop.f32.mrb[17].mxu1 }
 0x9fb   :  { %v1425_v52 = vsel %vm431_vm3, %v1419_v50, -inf }
 0x9fc   :  { %1426 = vmax.xlane.f32.xlu1 %v1425_v52 }
 0xa0d   :  { %1520 = vrot.lane.b32.xlu1 %v4256_v39, %s4064_s27 }
 0xa0e   :  { %1444 = vrot.lane.b32.xlu0 %v4258_v41, %s4064_s27 }
 0xa11   :  { %1598 = vrot.lane.b32.xlu1 %v4258_v41, %s4065_s29 }
 0xa15   :  { %1676 = vrot.lane.b32.xlu1 %v4256_v39, %s4065_s29 }
 0xa19   :  { %1674 = vrot.lane.b32.xlu1 %v4273_v45, %s4066_s5 }
 0xa85   :  { %v1424_v53 = vpop.xlane.xlu0 %1423 }
 0xa86   :  { %v1428_v55 = vsub.f32 %v1341_v44, %v1424_v53 }
 0xa88   :  { %v1430_v56 = vmul.f32 1.442695, %v1428_v55 }
 0xa89   :  { %v1445_v57 = vpop.permute.xlu0 %1444  ;;  %v1427_v58 = vpop.xlane.xlu1 %1426 }
 0xa8a   :  { %3859 = vpow2.f32 %v1430_v56  ;;  %v1429_v60 = vsub.f32 %v1419_v50, %v1427_v58  ;;  %3590 = vmatpush3.msra.mxu0 %v1445_v57 }
 0xa8b   :  { %3599 = vmatprep.subr.mxu0 %v4052_v36 }
 0xa8c   :  { %v1432_v61 = vmul.f32 1.442695, %v1429_v60 }
 0xa8d   :  { %v1521_v62 = vpop.permute.xlu1 %1520 }
 0xa8e   :  { %3861 = vpow2.f32 %v1432_v61  ;;  %3595 = vmatpush3.msra.mxu1 %v1521_v62 }
 0xa8f   :  { %3604 = vmatprep.subr.mxu1 %v4052_v36 }
 0xa91   :  { %v1599_v7 = vpop.permute.xlu1 %1598 }
 0xa94   :  { %v3860_v63 = vpop.eup %3859 }
 0xa95   :  { %v1434_v1 = vsel %vm431_vm3, %v3860_v63, 0.0  ;;  %v1677_v11 = vpop.permute.xlu1 %1676 }
 0xa96   :  { %1435 = vadd.xlane.f32.xlu0 %v1434_v1 }
 0xa98   :  { %v3862_v3 = vpop.eup %3861 }
 0xa99   :  { %v1437_v4 = vsel %vm431_vm3, %v3862_v3, 0.0  ;;  %v1675_v14 = vpop.permute.xlu1 %1674 }
 0xa9a   :  { %1438 = vadd.xlane.f32.xlu0 %v1437_v4 }
 0xab0   :  { %1596 = vrot.lane.b32.xlu0 %v4264_v43, %s4066_s5 }
 0xb23   :  { %v1436_v5 = vpop.xlane.xlu0 %1435 }
 0xb24   :  { %3863 = vrcp.f32 %v1436_v5 }
 0xb27   :  { %v1439_v6 = vpop.xlane.xlu0 %1438 }
 0xb28   :  { %3865 = vrcp.f32 %v1439_v6 }
 0xb2b   :  { %v1597_v13 = vpop.permute.xlu0 %1596 }
 0xb2e   :  { %v3864_v8 = vpop.eup %3863 }
 0xb2f   :  { %v1442_v9 = vmul.f32 %v3864_v8, %v3860_v63 }
 0xb31   :  { %3592 = vmatmul.mubr.msk.f32.vlgmr.msra.gmra.mrb[12].mxu0 %vm431_vm3, %v1442_v9 }
 0xb32   :  { %v3866_v10 = vpop.eup %3865  ;;  %3600 = vmatpush3.xpose.msk.msra.mxu0 %vm277_vm2, %v1599_v7  ;;  %3601 = vmatprep.mubr.msk.f32.mxu0 %vm4053_vm1, %v4052_v36 }
 0xb33   :  { %v1443_v12 = vmul.f32 %v3866_v10, %v3862_v3  ;;  %3609 = vmatprep.subr.mxu0 %v4052_v36 }
 0xb35   :  { %3597 = vmatmul.mubr.msk.f32.vlgmr.msra.gmra.mrb[18].mxu1 %vm431_vm3, %v1443_v12  ;;  %3602 = vmatmul.mubr.msk.f32.vlgmr.msra.gmra.mrb[14].mxu0 %vm277_vm2, %v1597_v13 }
 0xb36   :  { %3605 = vmatpush3.xpose.msk.msra.mxu1 %vm277_vm2, %v1677_v11  ;;  %3606 = vmatprep.mubr.msk.f32.mxu1 %vm4053_vm1, %v4052_v36 }
 0xb37   :  { %3614 = vmatprep.subr.mxu1 %v4052_v36  ;;  %3611 = vmatprep.mubr.msk.f32.mxu0 %vm4053_vm1, %v4052_v36 }
 0xb39   :  { %3607 = vmatmul.mubr.msk.f32.vlgmr.msra.gmra.mrb[20].mxu1 %vm277_vm2, %v1675_v14 }
 0xb3a   :  { %3616 = vmatprep.mubr.msk.f32.mxu1 %vm4053_vm1, %v4052_v36 }
 0xc04   :  { %v4422_v15 = vpop.f32.mrb[12].mxu0 }
 0xc05   :  { %v3593_v16 = vpop.f32.mrb[13].mxu0 }
 0xc08   :  { %v4424_v17 = vpop.f32.mrb[18].mxu1  ;;  %v1670_v18 = vpop.f32.mrb[14].mxu0 }
 0xc09   :  { %v1671_v19 = vadd.f32 %v1670_v18, %v4286_v54  ;;  %v3598_v20 = vpop.f32.mrb[19].mxu1  ;;  %v3603_v21 = vpop.f32.mrb[15].mxu0 }
 0xc0b   :  { %v1752_v22 = vsel %vm431_vm3, %v1671_v19, -inf }
 0xc0c   :  { %1753 = vmax.xlane.f32.xlu0 %v1752_v22  ;;  %v1748_v24 = vpop.f32.mrb[20].mxu1 }
 0xc0d   :  { %v1749_v26 = vadd.f32 %v1748_v24, %v4289_v59  ;;  %v3608_v27 = vpop.f32.mrb[21].mxu1 }
 0xc0f   :  { %v1755_v28 = vsel %vm431_vm3, %v1749_v26, -inf }
 0xc10   :  { %1756 = vmax.xlane.f32.xlu1 %v1755_v28 }
 0xc21   :  { %1850 = vrot.lane.b32.xlu1 %v4256_v39, %s4067_s28 }
 0xc22   :  { %1774 = vrot.lane.b32.xlu0 %v4258_v41, %s4067_s28 }
 0xc25   :  { %1928 = vrot.lane.b32.xlu1 %v4258_v41, %s4068_s12 }
 0xc29   :  { %2006 = vrot.lane.b32.xlu1 %v4256_v39, %s4068_s12 }
 0xc2d   :  { %2004 = vrot.lane.b32.xlu1 %v4273_v45, %s4069_s15 }
 0xc99   :  { %v1754_v29 = vpop.xlane.xlu0 %1753 }
 0xc9a   :  { %v1758_v30 = vsub.f32 %v1671_v19, %v1754_v29 }
 0xc9c   :  { %v1760_v31 = vmul.f32 1.442695, %v1758_v30 }
 0xc9d   :  { %v1775_v32 = vpop.permute.xlu0 %1774  ;;  %v1757_v33 = vpop.xlane.xlu1 %1756 }
 0xc9e   :  { %3867 = vpow2.f32 %v1760_v31  ;;  %v1759_v34 = vsub.f32 %v1749_v26, %v1757_v33  ;;  %3610 = vmatpush3.msra.mxu0 %v1775_v32 }
 0xc9f   :  { %3619 = vmatprep.subr.mxu0 %v4052_v36 }
 0xca0   :  { %v1762_v35 = vmul.f32 1.442695, %v1759_v34 }
 0xca1   :  { %v1851_v38 = vpop.permute.xlu1 %1850 }
 0xca2   :  { %3869 = vpow2.f32 %v1762_v35  ;;  %3615 = vmatpush3.msra.mxu1 %v1851_v38 }
 0xca3   :  { %3624 = vmatprep.subr.mxu1 %v4052_v36 }
 0xca5   :  { %v1929_v50 = vpop.permute.xlu1 %1928 }
 0xca8   :  { %v3868_v42 = vpop.eup %3867 }
 0xca9   :  { %v1764_v44 = vsel %vm431_vm3, %v3868_v42, 0.0  ;;  %v2007_v55 = vpop.permute.xlu1 %2006 }
 0xcaa   :  { %1765 = vadd.xlane.f32.xlu0 %v1764_v44 }
 0xcac   :  { %v3870_v46 = vpop.eup %3869 }
 0xcad   :  { %v1767_v47 = vsel %vm431_vm3, %v3870_v46, 0.0  ;;  %v2005_v58 = vpop.permute.xlu1 %2004 }
 0xcae   :  { %1768 = vadd.xlane.f32.xlu0 %v1767_v47 }
 0xcc4   :  { %1926 = vrot.lane.b32.xlu0 %v4264_v43, %s4069_s15 }
 0xd37   :  { %v1766_v48 = vpop.xlane.xlu0 %1765 }
 0xd38   :  { %3871 = vrcp.f32 %v1766_v48 }
 0xd3b   :  { %v1769_v49 = vpop.xlane.xlu0 %1768 }
 0xd3c   :  { %3873 = vrcp.f32 %v1769_v49 }
 0xd3f   :  { %v1927_v57 = vpop.permute.xlu0 %1926 }
 0xd42   :  { %v3872_v51 = vpop.eup %3871 }
 0xd43   :  { %v1772_v52 = vmul.f32 %v3872_v51, %v3868_v42 }
 0xd45   :  { %3612 = vmatmul.mubr.msk.f32.vlgmr.msra.gmra.mrb[16].mxu0 %vm431_vm3, %v1772_v52 }
 0xd46   :  { %v3874_v53 = vpop.eup %3873  ;;  %3620 = vmatpush3.xpose.msk.msra.mxu0 %vm277_vm2, %v1929_v50  ;;  %3621 = vmatprep.mubr.msk.f32.mxu0 %vm4053_vm1, %v4052_v36 }
 0xd47   :  { %v1773_v56 = vmul.f32 %v3874_v53, %v3870_v46  ;;  %3629 = vmatprep.subr.mxu0 %v4052_v36 }
 0xd49   :  { %3617 = vmatmul.mubr.msk.f32.vlgmr.msra.gmra.mrb[22].mxu1 %vm431_vm3, %v1773_v56  ;;  %3622 = vmatmul.mubr.msk.f32.vlgmr.msra.gmra.mrb[18].mxu0 %vm277_vm2, %v1927_v57 }
 0xd4a   :  { %3625 = vmatpush3.xpose.msk.msra.mxu1 %vm277_vm2, %v2007_v55  ;;  %3626 = vmatprep.mubr.msk.f32.mxu1 %vm4053_vm1, %v4052_v36 }
 0xd4b   :  { %3634 = vmatprep.subr.mxu1 %v4052_v36  ;;  %3631 = vmatprep.mubr.msk.f32.mxu0 %vm4053_vm1, %v4052_v36 }
 0xd4d   :  { %3627 = vmatmul.mubr.msk.f32.vlgmr.msra.gmra.mrb[24].mxu1 %vm277_vm2, %v2005_v58 }
 0xd4e   :  { %3636 = vmatprep.mubr.msk.f32.mxu1 %vm4053_vm1, %v4052_v36 }
 0xe18   :  { %v4456_v60 = vpop.f32.mrb[16].mxu0 }
 0xe19   :  { %v3613_v61 = vpop.f32.mrb[17].mxu0 }
 0xe1c   :  { %v4458_v62 = vpop.f32.mrb[22].mxu1  ;;  %v2000_v63 = vpop.f32.mrb[18].mxu0 }
 0xe1d   :  { %v2001_v1 = vadd.f32 %v2000_v63, %v4286_v54  ;;  %v3618_v3 = vpop.f32.mrb[23].mxu1  ;;  %v3623_v4 = vpop.f32.mrb[19].mxu0 }
 0xe1f   :  { %v2082_v5 = vsel %vm431_vm3, %v2001_v1, -inf }
 0xe20   :  { %2083 = vmax.xlane.f32.xlu0 %v2082_v5  ;;  %v2078_v6 = vpop.f32.mrb[24].mxu1 }
 0xe21   :  { %v2079_v7 = vadd.f32 %v2078_v6, %v4289_v59  ;;  %v3628_v8 = vpop.f32.mrb[25].mxu1 }
 0xe23   :  { %v2085_v9 = vsel %vm431_vm3, %v2079_v7, -inf }
 0xe24   :  { %2086 = vmax.xlane.f32.xlu1 %v2085_v9 }
 0xe35   :  { %2180 = vrot.lane.b32.xlu1 %v4256_v39, %s4070_s17 }
 0xe36   :  { %2104 = vrot.lane.b32.xlu0 %v4258_v41, %s4070_s17 }
 0xe39   :  { %2258 = vrot.lane.b32.xlu1 %v4258_v41, %s4071_s18 }
 0xe3d   :  { %2336 = vrot.lane.b32.xlu1 %v4256_v39, %s4071_s18 }
 0xe41   :  { %2334 = vrot.lane.b32.xlu1 %v4273_v45, %s4072_s2 }
 0xead   :  { %v2084_v10 = vpop.xlane.xlu0 %2083 }
 0xeae   :  { %v2088_v11 = vsub.f32 %v2001_v1, %v2084_v10 }
 0xeb0   :  { %v2090_v12 = vmul.f32 1.442695, %v2088_v11 }
 0xeb1   :  { %v2105_v13 = vpop.permute.xlu0 %2104  ;;  %v2087_v14 = vpop.xlane.xlu1 %2086 }
 0xeb2   :  { %3875 = vpow2.f32 %v2090_v12  ;;  %v2089_v16 = vsub.f32 %v2079_v7, %v2087_v14  ;;  %3630 = vmatpush3.msra.mxu0 %v2105_v13 }
 0xeb3   :  { %3639 = vmatprep.subr.mxu0 %v4052_v36 }
 0xeb4   :  { %v2092_v18 = vmul.f32 1.442695, %v2089_v16 }
 0xeb5   :  { %v2181_v19 = vpop.permute.xlu1 %2180 }
 0xeb6   :  { %3877 = vpow2.f32 %v2092_v18  ;;  %3635 = vmatpush3.msra.mxu1 %v2181_v19 }
 0xeb7   :  { %3644 = vmatprep.subr.mxu1 %v4052_v36 }
 0xeb9   :  { %v2259_v28 = vpop.permute.xlu1 %2258 }
 0xebc   :  { %v3876_v20 = vpop.eup %3875 }
 0xebd   :  { %v2094_v21 = vsel %vm431_vm3, %v3876_v20, 0.0  ;;  %v2337_v32 = vpop.permute.xlu1 %2336 }
 0xebe   :  { %2095 = vadd.xlane.f32.xlu0 %v2094_v21 }
 0xec0   :  { %v3878_v22 = vpop.eup %3877 }
 0xec1   :  { %v2097_v24 = vsel %vm431_vm3, %v3878_v22, 0.0  ;;  %v2335_v35 = vpop.permute.xlu1 %2334 }
 0xec2   :  { %2098 = vadd.xlane.f32.xlu0 %v2097_v24 }
 0xed8   :  { %2256 = vrot.lane.b32.xlu0 %v4264_v43, %s4072_s2 }
 0xf4b   :  { %v2096_v26 = vpop.xlane.xlu0 %2095 }
 0xf4c   :  { %3879 = vrcp.f32 %v2096_v26 }
 0xf4f   :  { %v2099_v27 = vpop.xlane.xlu0 %2098 }
 0xf50   :  { %3881 = vrcp.f32 %v2099_v27 }
 0xf53   :  { %v2257_v34 = vpop.permute.xlu0 %2256 }
 0xf56   :  { %v3880_v29 = vpop.eup %3879 }
 0xf57   :  { %v2102_v30 = vmul.f32 %v3880_v29, %v3876_v20 }
 0xf59   :  { %3632 = vmatmul.mubr.msk.f32.vlgmr.msra.gmra.mrb[20].mxu0 %vm431_vm3, %v2102_v30 }
 0xf5a   :  { %v3882_v31 = vpop.eup %3881  ;;  %3640 = vmatpush3.xpose.msk.msra.mxu0 %vm277_vm2, %v2259_v28  ;;  %3641 = vmatprep.mubr.msk.f32.mxu0 %vm4053_vm1, %v4052_v36 }
 0xf5b   :  { %v2103_v33 = vmul.f32 %v3882_v31, %v3878_v22  ;;  %3649 = vmatprep.subr.mxu0 %v4052_v36 }
 0xf5d   :  { %3637 = vmatmul.mubr.msk.f32.vlgmr.msra.gmra.mrb[26].mxu1 %vm431_vm3, %v2103_v33  ;;  %3642 = vmatmul.mubr.msk.f32.vlgmr.msra.gmra.mrb[22].mxu0 %vm277_vm2, %v2257_v34 }
 0xf5e   :  { %3645 = vmatpush3.xpose.msk.msra.mxu1 %vm277_vm2, %v2337_v32  ;;  %3646 = vmatprep.mubr.msk.f32.mxu1 %vm4053_vm1, %v4052_v36 }
 0xf5f   :  { %3654 = vmatprep.subr.mxu1 %v4052_v36  ;;  %3651 = vmatprep.mubr.msk.f32.mxu0 %vm4053_vm1, %v4052_v36 }
 0xf61   :  { %3647 = vmatmul.mubr.msk.f32.vlgmr.msra.gmra.mrb[28].mxu1 %vm277_vm2, %v2335_v35 }
 0xf62   :  { %3656 = vmatprep.mubr.msk.f32.mxu1 %vm4053_vm1, %v4052_v36 }
0x102c   :  { %v4490_v38 = vpop.f32.mrb[20].mxu0 }
0x102d   :  { %v3633_v42 = vpop.f32.mrb[21].mxu0 }
0x1030   :  { %v4492_v44 = vpop.f32.mrb[26].mxu1  ;;  %v2330_v46 = vpop.f32.mrb[22].mxu0 }
0x1031   :  { %v2331_v47 = vadd.f32 %v2330_v46, %v4286_v54  ;;  %v3638_v48 = vpop.f32.mrb[27].mxu1  ;;  %v3643_v49 = vpop.f32.mrb[23].mxu0 }
0x1032   :  { %v2994_v49 = vld [vmem:[#allocation8 + $0x18] sm:$0xff] }
0x1033   :  { %v2412_v50 = vsel %vm431_vm3, %v2331_v47, -inf }
0x1034   :  { %2413 = vmax.xlane.f32.xlu0 %v2412_v50  ;;  %v2408_v51 = vpop.f32.mrb[28].mxu1 }
0x1035   :  { %v2409_v52 = vadd.f32 %v2408_v51, %v4289_v59  ;;  %v3648_v53 = vpop.f32.mrb[29].mxu1 }
0x1037   :  { %v2415_v55 = vsel %vm431_vm3, %v2409_v52, -inf }
0x1038   :  { %2416 = vmax.xlane.f32.xlu1 %v2415_v55 }
0x1049   :  { %2510 = vrot.lane.b32.xlu1 %v4256_v39, %s4073_s3 }
0x104a   :  { %2434 = vrot.lane.b32.xlu0 %v4258_v41, %s4073_s3 }
0x104d   :  { %2588 = vrot.lane.b32.xlu1 %v4258_v41, %s4074_s19 }
0x1051   :  { %2666 = vrot.lane.b32.xlu1 %v4256_v39, %s4074_s19 }
0x1055   :  { %2664 = vrot.lane.b32.xlu1 %v4273_v45, %s4075_s1 }
0x10c1   :  { %v2414_v56 = vpop.xlane.xlu0 %2413 }
0x10c2   :  { %v2418_v57 = vsub.f32 %v2331_v47, %v2414_v56 }
0x10c4   :  { %v2420_v58 = vmul.f32 1.442695, %v2418_v57 }
0x10c5   :  { %v2435_v61 = vpop.permute.xlu0 %2434  ;;  %v2417_v63 = vpop.xlane.xlu1 %2416 }
0x10c6   :  { %3883 = vpow2.f32 %v2420_v58  ;;  %v2419_v1 = vsub.f32 %v2409_v52, %v2417_v63  ;;  %3650 = vmatpush3.msra.mxu0 %v2435_v61 }
0x10c7   :  { %3659 = vmatprep.subr.mxu0 %v4052_v36 }
0x10c8   :  { %v2422_v3 = vmul.f32 1.442695, %v2419_v1 }
0x10c9   :  { %v2511_v4 = vpop.permute.xlu1 %2510 }
0x10ca   :  { %3885 = vpow2.f32 %v2422_v3  ;;  %3655 = vmatpush3.msra.mxu1 %v2511_v4 }
0x10cb   :  { %3664 = vmatprep.subr.mxu1 %v4052_v36 }
0x10cd   :  { %v2589_v10 = vpop.permute.xlu1 %2588 }
0x10d0   :  { %v3884_v5 = vpop.eup %3883 }
0x10d1   :  { %v2424_v6 = vsel %vm431_vm3, %v3884_v5, 0.0  ;;  %v2667_v14 = vpop.permute.xlu1 %2666 }
0x10d2   :  { %2425 = vadd.xlane.f32.xlu0 %v2424_v6 }
0x10d4   :  { %v3886_v45 = vpop.eup %3885 }
0x10d5   :  { %v2427_v7 = vsel %vm431_vm3, %v3886_v45, 0.0  ;;  %v2665_v18 = vpop.permute.xlu1 %2664 }
0x10d6   :  { %2428 = vadd.xlane.f32.xlu0 %v2427_v7 }
0x10ec   :  { %2586 = vrot.lane.b32.xlu0 %v4264_v43, %s4075_s1  ;;  %s4083_s1 = smov [#allocation11]  }
0x115f   :  { %v2426_v8 = vpop.xlane.xlu0 %2425 }
0x1160   :  { %3887 = vrcp.f32 %v2426_v8 }
0x1163   :  { %v2429_v9 = vpop.xlane.xlu0 %2428 }
0x1164   :  { %3889 = vrcp.f32 %v2429_v9 }
0x1167   :  { %v2587_v43 = vpop.permute.xlu0 %2586 }
0x116a   :  { %v3888_v11 = vpop.eup %3887 }
0x116b   :  { %v2432_v12 = vmul.f32 %v3888_v11, %v3884_v5 }
0x116d   :  { %3652 = vmatmul.mubr.msk.f32.vlgmr.msra.gmra.mrb[24].mxu0 %vm431_vm3, %v2432_v12 }
0x116e   :  { %v3890_v13 = vpop.eup %3889  ;;  %3660 = vmatpush3.xpose.msk.msra.mxu0 %vm277_vm2, %v2589_v10  ;;  %3661 = vmatprep.mubr.msk.f32.mxu0 %vm4053_vm1, %v4052_v36 }
0x116f   :  { %v2433_v16 = vmul.f32 %v3890_v13, %v3886_v45  ;;  %3669 = vmatprep.subr.mxu0 %v4052_v36 }
0x1171   :  { %3657 = vmatmul.mubr.msk.f32.vlgmr.msra.gmra.mrb[30].mxu1 %vm431_vm3, %v2433_v16  ;;  %3662 = vmatmul.mubr.msk.f32.vlgmr.msra.gmra.mrb[26].mxu0 %vm277_vm2, %v2587_v43 }
0x1172   :  { %3665 = vmatpush3.xpose.msk.msra.mxu1 %vm277_vm2, %v2667_v14  ;;  %3666 = vmatprep.mubr.msk.f32.mxu1 %vm4053_vm1, %v4052_v36 }
0x1173   :  { %3674 = vmatprep.subr.mxu1 %v4052_v36  ;;  %3671 = vmatprep.mubr.msk.f32.mxu0 %vm4053_vm1, %v4052_v36 }
0x1175   :  { %3667 = vmatmul.mubr.msk.f32.vlgmr.msra.gmra.mrb[32].mxu1 %vm277_vm2, %v2665_v18 }
0x1176   :  { %3676 = vmatprep.mubr.msk.f32.mxu1 %vm4053_vm1, %v4052_v36 }
0x1240   :  { %v2506_v19 = vpop.f32.mrb[24].mxu0 }
0x1241   :  { %v3653_v20 = vpop.f32.mrb[25].mxu0 }
0x1244   :  { %v2582_v21 = vpop.f32.mrb[30].mxu1  ;;  %v2660_v22 = vpop.f32.mrb[26].mxu0 }
0x1245   :  { %v2661_v24 = vadd.f32 %v2660_v22, %v4286_v54  ;;  %v3658_v26 = vpop.f32.mrb[31].mxu1  ;;  %v3663_v27 = vpop.f32.mrb[27].mxu0 }
0x1247   :  { %v2742_v28 = vsel %vm431_vm3, %v2661_v24, -inf }
0x1248   :  { %2743 = vmax.xlane.f32.xlu0 %v2742_v28  ;;  %v2738_v29 = vpop.f32.mrb[32].mxu1 }
0x1249   :  { %v2739_v30 = vadd.f32 %v2738_v29, %v4289_v59  ;;  %v3668_v31 = vpop.f32.mrb[33].mxu1 }
0x124b   :  { %v2745_v32 = vsel %vm431_vm3, %v2739_v30, -inf }
0x124c   :  { %2746 = vmax.xlane.f32.xlu1 %v2745_v32  ;;  %v3904_v32 = vld [vmem:[#allocation2] sm:$0xff] }
0x125d   :  { %2840 = vrot.lane.b32.xlu1 %v4256_v39, %s4076_s24 }
0x1261   :  { %2918 = vrot.lane.b32.xlu1 %v4354_v0, %s4077_s0 }
0x1265   :  { %2920 = vrot.lane.b32.xlu1 %v4356_v2, %s4077_s0 }
0x1269   :  { %2928 = vrot.lane.b32.xlu1 %v4390_v40, %s4048_s26 }
0x126d   :  { %2936 = vrot.lane.b32.xlu1 %v4424_v17, %s4078_s20 }
0x1271   :  { %2944 = vrot.lane.b32.xlu1 %v4458_v62, %s4079_s21 }
0x1275   :  { %2952 = vrot.lane.b32.xlu1 %v4492_v44, %s4080_s6 }
0x1279   :  { %2960 = vrot.lane.b32.xlu1 %v2582_v21, %s4081_s16 }
0x12d5   :  { %v2744_v36 = vpop.xlane.xlu0 %2743 }
0x12d6   :  { %v2748_v39 = vsub.f32 %v2661_v24, %v2744_v36 }
0x12d8   :  { %v2750_v54 = vmul.f32 1.442695, %v2748_v39 }
0x12d9   :  { %v2747_v59 = vpop.xlane.xlu1 %2746 }
0x12da   :  { %3891 = vpow2.f32 %v2750_v54  ;;  %v2749_v0 = vsub.f32 %v2739_v30, %v2747_v59  ;;  %v3903_v30 = vld [vmem:[#allocation2 + $0x8] sm:$0xff] }
0x12dc   :  { %v2752_v2 = vmul.f32 1.442695, %v2749_v0 }
0x12dd   :  { %v2841_v33 = vpop.permute.xlu1 %2840 }
0x12de   :  { %3893 = vpow2.f32 %v2752_v2  ;;  %3675 = vmatpush3.msra.mxu1 %v2841_v33 }
0x12e1   :  { %v2919_v56 = vpop.permute.xlu1 %2918 }
0x12e2   :  { %v2972_v45 = vsel %vm277_vm2, %v4320_v23, %v2919_v56  ;;  %v3229_v56 = vld [vmem:[#allocation10 + $0x30] sm:$0xff] }
0x12e4   :  { %v3892_v40 = vpop.eup %3891 }
0x12e5   :  { %v2754_v17 = vsel %vm431_vm3, %v3892_v40, 0.0  ;;  %v2921_v57 = vpop.permute.xlu1 %2920 }
0x12e6   :  { %2755 = vadd.xlane.f32.xlu0 %v2754_v17  ;;  %v2973_v11 = vsel %vm277_vm2, %v4322_v25, %v2921_v57  ;;  %v3399_v25 = vld [vmem:[%s4626_s7] ss:$0 sm:$0xff]  ;;  %v3230_v57 = vld [vmem:[#allocation10 + $0x38] sm:$0xff] }
0x12e8   :  { %v3894_v62 = vpop.eup %3893 }
0x12e9   :  { %v2757_v34 = vsel %vm431_vm3, %v3894_v62, 0.0  ;;  %v2929_v61 = vpop.permute.xlu1 %2928 }
0x12ea   :  { %2758 = vadd.xlane.f32.xlu0 %v2757_v34  ;;  %v2975_v13 = vsel %vm431_vm3, %v2973_v11, %v2929_v61  ;;  %v3231_v61 = vld [vmem:[#allocation10 + $0x40] sm:$0xff] }
0x12ed   :  { %v2937_v1 = vpop.permute.xlu1 %2936 }
0x12ee   :  { %v2978_v23 = vsel %vm2976_vm4, %v2975_v13, %v2937_v1 }
0x12f1   :  { %v2945_v4 = vpop.permute.xlu1 %2944 }
0x12f5   :  { %v2953_v6 = vpop.permute.xlu1 %2952 }
0x12f9   :  { %v2961_v14 = vpop.permute.xlu1 %2960 }
0x1300   :  { %2764 = vrot.lane.b32.xlu0 %v4258_v41, %s4076_s24  ;;  %s3330_s24 = sshll.u32 %s4083_s1, 4  ;;  %s3331_s24 = int_to_ptr.vmem [resolvable:$true] %s3330_s24 }
0x1301   :  { %p4020_p13 = scmp.lt.s32.totalorder %s3331_s24, %s3331_s24 }
0x1304   :  { %2926 = vrot.lane.b32.xlu0 %v4388_v37, %s4048_s26  ;;  %v2991_v37 = vld [vmem:[#allocation8] sm:$0xff] }
0x1308   :  { %2934 = vrot.lane.b32.xlu0 %v4422_v15, %s4078_s20  ;;  %v2992_v15 = vld [vmem:[#allocation8 + $0x8] sm:$0xff] }
0x130c   :  { %2942 = vrot.lane.b32.xlu0 %v4456_v60, %s4079_s21  ;;  %v3744_v60 = vpack.c.bf16 %v2992_v15, %v2991_v37  ;;  %v3223_v15 = vld [vmem:[#allocation10] sm:$0xff] }
0x130e   :  { %3745 = vmatprep.subr.bf16.mxu1 %v3744_v60 }
0x1310   :  { %2950 = vrot.lane.b32.xlu0 %v4490_v38, %s4080_s6  ;;  %v2993_v38 = vld [vmem:[#allocation8 + $0x10] sm:$0xff] }
0x1311   :  { %v3748_v50 = vpack.c.bf16 %v2994_v49, %v2993_v38  ;;  %v3225_v38 = vld [vmem:[#allocation10 + $0x10] sm:$0xff] }
0x1314   :  { %2958 = vrot.lane.b32.xlu0 %v2506_v19, %s4081_s16  ;;  %v2981_v19 = vsel %vm2979_vm5, %v2978_v23, %v2945_v4  ;;  %v3234_v4 = vld [vmem:[#allocation10 + $0x58] sm:$0xff]  ;;  %v3403_v23 = vld [vmem:[%s4628_s9] ss:$0 sm:$0xff] }
0x1315   :  { %v2984_v20 = vsel %vm2982_vm6, %v2981_v19, %v2953_v6  ;;  %v3235_v6 = vld [vmem:[#allocation10 + $0x60] sm:$0xff] }
0x1316   :  { %v2987_v21 = vsel %vm2985_vm8, %v2984_v20, %v2961_v14 }
0x1373   :  { %v2756_v35 = vpop.xlane.xlu0 %2755 }
0x1374   :  { %3895 = vrcp.f32 %v2756_v35 }
0x1377   :  { %v2759_v42 = vpop.xlane.xlu0 %2758 }
0x1378   :  { %3897 = vrcp.f32 %v2759_v42 }
0x137b   :  { %v2765_v44 = vpop.permute.xlu0 %2764 }
0x137c   :  { %3670 = vmatpush3.msra.mxu0 %v2765_v44  ;;  %v3129_v44 = vld [vmem:[%s4629_s10] sm:$0xff] }
0x137e   :  { %v3896_v46 = vpop.eup %3895 }
0x137f   :  { %v2762_v47 = vmul.f32 %v3896_v46, %v3892_v40  ;;  %v2927_v58 = vpop.permute.xlu0 %2926  ;;  %v3130_v46 = vld [vmem:[%s4629_s10 + $0x8] sm:$0xff] }
0x1380   :  { %v2974_v7 = vsel %vm431_vm3, %v2972_v45, %v2927_v58  ;;  %v3772_v58 = vpack.c.bf16 %v3230_v57, %v3229_v56  ;;  %v3236_v45 = vld [vmem:[#allocation10 + $0x68] sm:$0xff] }
0x1381   :  { %3672 = vmatmul.mubr.msk.f32.vlgmr.msra.gmra.mrb[28].mxu0 %vm431_vm3, %v2762_v47  ;;  %v3752_v47 = vpack.c.bf16 %v3130_v46, %v3129_v44 }
0x1382   :  { %v3898_v41 = vpop.eup %3897 }
0x1383   :  { %v2763_v48 = vmul.f32 %v3898_v41, %v3894_v62  ;;  %v2935_v63 = vpop.permute.xlu0 %2934  ;;  %v3131_v41 = vld [vmem:[%s4629_s10 + $0x10] sm:$0xff] }
0x1384   :  { %v2977_v9 = vsel %vm2976_vm4, %v2974_v7, %v2935_v63  ;;  %v3232_v63 = vld [vmem:[#allocation10 + $0x48] sm:$0xff]  ;;  %v3784_v7 = vpack.c.bf16 %v3236_v45, %v3235_v6 }
0x1385   :  { %3677 = vmatmul.mubr.msk.f32.vlgmr.msra.gmra.mrb[34].mxu1 %vm431_vm3, %v2763_v48  ;;  %v3132_v48 = vld [vmem:[%s4629_s10 + $0x18] sm:$0xff]  ;;  %v3776_v1 = vpack.c.bf16 %v3232_v63, %v3231_v61 }
0x1386   :  { %3747 = vmatpush3.bf16.msra.mxu1 %v3744_v60  ;;  %v3756_v37 = vpack.c.bf16 %v3132_v48, %v3131_v41  ;;  %v3224_v60 = vld [vmem:[#allocation10 + $0x8] sm:$0xff] }
0x1387   :  { %3749 = vmatprep.subr.bf16.mxu1 %v3748_v50  ;;  %v2943_v3 = vpop.permute.xlu0 %2942  ;;  %v3760_v49 = vpack.c.bf16 %v3224_v60, %v3223_v15 }
0x1388   :  { %v2980_v10 = vsel %vm2979_vm5, %v2977_v9, %v2943_v3  ;;  %v3233_v3 = vld [vmem:[#allocation10 + $0x50] sm:$0xff] }
0x1389   :  { %3761 = vmatprep.subr.bf16.mxu0 %v3760_v49 }
0x138a   :  { %3751 = vmatpush3.bf16.msra.mxu1 %v3748_v50  ;;  %v3226_v50 = vld [vmem:[#allocation10 + $0x18] sm:$0xff]  ;;  %3763 = vmatpush3.bf16.msra.mxu0 %v3760_v49 }
0x138b   :  { %v2951_v5 = vpop.permute.xlu0 %2950  ;;  %3753 = vmatprep.subr.bf16.mxu1 %v3752_v47 }
0x138c   :  { %v2983_v12 = vsel %vm2982_vm6, %v2980_v10, %v2951_v5  ;;  %v3780_v5 = vpack.c.bf16 %v3234_v4, %v3233_v3 }
0x138f   :  { %v2959_v8 = vpop.permute.xlu0 %2958 }
0x1390   :  { %v2986_v16 = vsel %vm2985_vm8, %v2983_v12, %v2959_v8 }
0x1454   :  { %v2836_v51 = vpop.f32.mrb[28].mxu0 }
0x1455   :  { %2966 = vrot.lane.b32.xlu0 %v2836_v51, %s4082_s22  ;;  %v3673_v52 = vpop.f32.mrb[29].mxu0  ;;  %v3764_v51 = vpack.c.bf16 %v3226_v50, %v3225_v38 }
0x1456   :  { %v3227_v52 = vld [vmem:[#allocation10 + $0x20] sm:$0xff] }
0x1457   :  { %3765 = vmatprep.subr.bf16.mxu0 %v3764_v51 }
0x1458   :  { %v2912_v53 = vpop.f32.mrb[34].mxu1  ;;  %3767 = vmatpush3.bf16.msra.mxu0 %v3764_v51 }
0x1459   :  { %2968 = vrot.lane.b32.xlu1 %v2912_v53, %s4082_s22  ;;  %v3678_v55 = vpop.f32.mrb[35].mxu1  ;;  %v3228_v53 = vld [vmem:[#allocation10 + $0x28] sm:$0xff] }
0x145a   :  { %v3768_v55 = vpack.c.bf16 %v3228_v53, %v3227_v52 }
0x145c   :  { %3769 = vmatprep.subr.bf16.mxu0 %v3768_v55 }
0x145d   :  { %3771 = vmatpush3.bf16.msra.mxu0 %v3768_v55 }
0x145e   :  { %3773 = vmatprep.subr.bf16.mxu0 %v3772_v58 }
0x1461   :  { %3775 = vmatpush3.bf16.msra.mxu0 %v3772_v58 }
0x1462   :  { %3777 = vmatprep.subr.bf16.mxu0 %v3776_v1 }
0x1465   :  { %3779 = vmatpush3.bf16.msra.mxu0 %v3776_v1 }
0x1466   :  { %3781 = vmatprep.subr.bf16.mxu0 %v3780_v5 }
0x1469   :  { %3783 = vmatpush3.bf16.msra.mxu0 %v3780_v5 }
0x146a   :  { %3785 = vmatprep.subr.bf16.mxu0 %v3784_v7 }
0x146d   :  { %3787 = vmatpush3.bf16.msra.mxu0 %v3784_v7 }
0x14c7   :  { %v2967_v43 = vpop.permute.xlu0 %2966 }
0x14c8   :  { %v2989_v18 = vsel %vm2988_vm7, %v2986_v16, %v2967_v43  ;;  %v3402_v16 = vld [vmem:[%s4627_s8] ss:$0 sm:$0xff] }
0x14c9   :  { %3687 = vmatprep.mubr.msk.f32.mxu1 %vm124_vm0, %v2989_v18 }
0x14cb   :  { %v2969_v22 = vpop.permute.xlu1 %2968 }
0x14cc   :  { %v2990_v24 = vsel %vm2988_vm7, %v2987_v21, %v2969_v22 }
0x14cd   :  { %3688 = vmatmul.mubr.msk.f32.vlgmr.msra.gmra.mrb[36].mxu1 %vm124_vm0, %v2990_v24 }
0x14ce   :  { %3755 = vmatpush3.bf16.msra.mxu1 %v3752_v47 }
0x14cf   :  { %3757 = vmatprep.subr.bf16.mxu1 %v3756_v37 }
0x14d2   :  { %3759 = vmatpush3.bf16.msra.mxu1 %v3756_v37 }
0x15a0   :  { %v3689_v26 = vpop.f32.mrb[36].mxu1 }
0x15a1   :  { %v3080_v27 = vadd.f32 %v3689_v26, %v3399_v25  ;;  %v3074_v28 = vpop.f32.mrb[37].mxu1  ;;  %v3238_v26 = vld [vmem:[#allocation10 + $0x78] sm:$0xff] }
0x15a2   :  { %v3075_v29 = vadd.f32 %v3399_v25, %v3074_v28  ;;  %v3237_v25 = vld [vmem:[#allocation10 + $0x70] sm:$0xff]  ;;  %v3404_v28 = vld [vmem:[%s4630_s11] ss:$0 sm:$0xff]  ;;  %s4015_s11 = scalar_lea.vmem %s3331_s24, 256 }
0x15a3   :  { %v4557_v31 = vadd.f32 %v3903_v30, %v3080_v27  ;;  %v3788_v27 = vpack.c.bf16 %v3238_v26, %v3237_v25  ;;  %p4016_p12 = scmp.ne.s32.totalorder %s3331_s24, %s4015_s11  ;;  %p4021_p0 = scmp.lt.s32.totalorder %s4015_s11, %s4015_s11 }
0x15a4   :  { %v4559_v36 = vadd.f32 %v3904_v32, %v3075_v29 }
0x15a5   :  { %v3090_v39 = vsel %vm124_vm0, %v4557_v31, 0.0  ;;  %3789 = vmatprep.subr.bf16.mxu0 %v3788_v27  ;;  %p4022_p1 = por %p4021_p0, %p4020_p13 }
0x15a6   :  { %3091 = vadd.xlane.f32.xlu1 %v3090_v39  ;;  %v3087_v54 = vsel %vm124_vm0, %v4559_v36, 0.0  ;;  %3791 = vmatpush3.bf16.msra.mxu0 %v3788_v27 }
0x15a7   :  { %3088 = vadd.xlane.f32.xlu0 %v3087_v54  ;;  %p4023_p2 = pnand %p4022_p1, %p4016_p12 }
0x1633   :  { %v3092_v59 = vpop.xlane.xlu1 %3091 }
0x1634   :  { %v3094_v0 = vmul.f32 0.03125, %v3092_v59  ;;  %v3089_v2 = vpop.xlane.xlu0 %3088 }
0x1635   :  { %v3093_v33 = vmul.f32 0.03125, %v3089_v2 }
0x1636   :  { %v4566_v40 = vsub.f32 %v4557_v31, %v3094_v0  ;;  %v3407_v0 = vld [vmem:[%s4632_s13] ss:$0 sm:$0xff] }
0x1637   :  { %v3095_v17 = vsub.f32 %v4559_v36, %v3093_v33 }
0x1638   :  { %v3098_v35 = vmul.f32 %v4566_v40, %v4566_v40 }
0x1639   :  { %v3097_v62 = vmul.f32 %v3095_v17, %v3095_v17 }
0x163a   :  { %v3102_v42 = vsel %vm124_vm0, %v3098_v35, 0.0 }
0x163b   :  { %v3099_v34 = vsel %vm124_vm0, %v3097_v62, 0.0 }
0x163c   :  { %3100 = vadd.xlane.f32.xlu0 %v3099_v34 }
0x1640   :  { %3103 = vadd.xlane.f32.xlu0 %v3102_v42 }
0x16c9   :  { %v3101_v8 = vpop.xlane.xlu0 %3100 }
0x16ca   :  { %v3105_v9 = vmul.f32 0.03125, %v3101_v8 }
0x16cc   :  { %v3107_v10 = vadd.f32 1e-05, %v3105_v9 }
0x16cd   :  { %v3104_v11 = vpop.xlane.xlu0 %3103 }
0x16ce   :  { %3899 = vrsqrt.f32 %v3107_v10  ;;  %v3106_v12 = vmul.f32 0.03125, %v3104_v11 }
0x16d0   :  { %v3108_v13 = vadd.f32 1e-05, %v3106_v12 }
0x16d2   :  { %3901 = vrsqrt.f32 %v3108_v13 }
0x16d8   :  { %v3900_v14 = vpop.eup %3899 }
0x16d9   :  { %v3111_v43 = vmul.f32 %v3900_v14, %v3095_v17 }
0x16db   :  { %v3119_v18 = vmul.f32 %v3402_v16, %v3111_v43 }
0x16dc   :  { %v3902_v19 = vpop.eup %3901 }
0x16dd   :  { %v3112_v20 = vmul.f32 %v3902_v19, %v4566_v40  ;;  %v3127_v21 = vadd.f32 %v3403_v23, %v3119_v18 }
0x16df   :  { %v3120_v22 = vmul.f32 %v3402_v16, %v3112_v20  ;;  %3698 = vmatprep.mubr.msk.f32.mxu1 %vm124_vm0, %v3127_v21 }
0x16e1   :  { %v3128_v24 = vadd.f32 %v3403_v23, %v3120_v22 }
0x16e3   :  { %3699 = vmatmul.mubr.msk.f32.vlgmr.msra.gmra.mrb[38].mxu1 %vm124_vm0, %v3128_v24 }
0x17b6   :  { %v3700_v29 = vpop.f32.mrb[38].mxu1 }
0x17b7   :  { %v3218_v30 = vadd.f32 %v3700_v29, %v3404_v28  ;;  %v3212_v32 = vpop.f32.mrb[39].mxu1 }
0x17b8   :  { %v3213_v39 = vadd.f32 %v3404_v28, %v3212_v32 }
0x17b9   :  { %v3222_v59 = vmax.f32 %v3218_v30, 0.0 }
0x17ba   :  { %v3221_v54 = vmax.f32 %v3213_v39, 0.0 }
0x17bc   :  { %3733 = vmatprep.mubr.f32.mxu0 %v3221_v54 }
0x17bd   :  { %3734 = vmatmul.mubr.f32.vlgmr.msra.gmra.mrb[30].mxu0 %v3222_v59 }
0x1890   :  { %v3735_v2 = vpop.f32.mrb[30].mxu0 }
0x1891   :  { %v3318_v33 = vadd.f32 %v3735_v2, %v3407_v0  ;;  %v3312_v40 = vpop.f32.mrb[31].mxu0 }
0x1892   :  { %v3313_v17 = vadd.f32 %v3407_v0, %v3312_v40 }
0x1893   :  { %v3322_v62 = vadd.f32 %v3318_v33, %v4557_v31 }
0x1894   :  { %v3321_v34 = vadd.f32 %v3313_v17, %v4559_v36 }
0x1895   :  { %3324 = vst.msk [vmem:[#allocation11 + $0x8] sm:$0xff] %vm124_vm0, %v3322_v62 }
0x1896   :  { %3323 = vst.msk [vmem:[#allocation11] sm:$0xff] %vm124_vm0, %v3321_v34 }
0x1897   :  { %4026 = shalt.err (!%p4023_p2)
}
0x1898   :  { %s4027_s20 = scalar_lea.hbm %s4633_s14, 256 }
0x1899   :  { %p4028_p3 = scmp.ne.s32.totalorder %s4633_s14, %s4027_s20  ;;  %p4031_p4 = scmp.lt.u32.totalorder %s4027_s20, %s4633_s14 }
0x189b   :  { %p4033_p5 = pnand %p4031_p4, %p4028_p3 }
0x189d   :  { %4036 = shalt.err (!%p4033_p5)
}
0x189e   :  { %3336 = dma.vmem_to_hbm [thread:$0]  %s3331_s24, 256, %s4633_s14, [#allocation4], %s4047_s25, %s4047_s25, %s4048_s26  }
0x189f   :  { %4043 = dma.done.wait [#allocation4], 256  }
0x18a0   :  { %4044 = vsyncadd [#allocation4], 4294967040 }
0x18a1   :  { %3340 = vsyncpa [#allocation3], 1 }
0x18a2   :  { %3341 = vsyncpa [#allocation6], 1 }
0x18a3   :  { %3342 = vsyncpa [#allocation9], 1 }
0x18a4   :  { %3343 = vsyncpa [#allocation4], 1 }

</bundles_post_ra>
